<compile_context>
chip_gen: v5e
topology: v5e:2x2
jax: 0.10.0
libtpu: 0.0.40
codegen_flags: <defaults>
</compile_context>

<pallas_src>
import jax
import jax.numpy as jnp
from jax import lax
from jax.experimental import pallas as pl
from jax.experimental.pallas import tpu as pltpu


def gru_kernel(x_ref, wih_ref, whh_ref, bias3_ref, bhhn_ref, hlast_ref, gi_ref):
    """Single invocation: hoisted input-gate matmul + unrolled GRU recurrence."""
    TB, H = x_ref.shape                  # (T*Bp, H), bf16
    Bp = hlast_ref.shape[0]
    T = TB // Bp

    # (1) Hoisted input path: one big parallel MXU matmul covering every time
    #     step, f32 accumulation; biases (b_ih+b_hh for r/z, b_ih for n) folded.
    gi_ref[...] = (
        jnp.dot(x_ref[...], wih_ref[...], preferred_element_type=jnp.float32)
        + bias3_ref[...]
    )

    whh = whh_ref[...]                                    # bf16 weight stays resident
    bhh_n = jnp.broadcast_to(bhhn_ref[...], (Bp, H))      # broadcast hoisted out of loop

    # (2) Serial recurrence: only h @ W_hh^T per step; fully unrolled (T small).
    def step(t, h):
        row = pl.multiple_of(t * Bp, Bp)                  # aligned sublane offset
        gi = gi_ref[pl.ds(row, Bp), :]                    # (Bp, 3H) f32, precomputed
        gh = jnp.dot(h.astype(jnp.bfloat16), whh,
                     preferred_element_type=jnp.float32)  # (Bp, 3H) f32
        r = jax.nn.sigmoid(gi[:, :H] + gh[:, :H])
        z = jax.nn.sigmoid(gi[:, H:2 * H] + gh[:, H:2 * H])
        n = jnp.tanh(gi[:, 2 * H:] + r * (gh[:, 2 * H:] + bhh_n))
        return (1.0 - z) * n + z * h

    h0 = jnp.zeros((Bp, H), jnp.float32)
    hlast_ref[...] = lax.fori_loop(0, T, step, h0, unroll=True)


def rnn_classifier_forward(tokens, params):
    """Model.forward: embedding -> GRU -> Linear(H,1) on last hidden -> (B,)."""
    emb_table = params["embedding"]                   # (V, H)
    w_ih, w_hh = params["w_ih"], params["w_hh"]       # (3H, H)
    b_ih, b_hh = params["b_ih"], params["b_hh"]       # (3H,)
    w_out, b_out = params["w_out"], params["b_out"]   # (1, H), (1,)

    B, T = tokens.shape
    H = emb_table.shape[1]
    Bp = max(8, ((B + 7) // 8) * 8)                   # pad batch to 8-sublane minimum

    # Embedding lookup (data-dependent gather: plain-JAX glue), time-major,
    # zero-pad batch rows, flatten to (T*Bp, H); MXU operands cast to bf16.
    embedded = emb_table[tokens]                              # (B, T, H)
    emb_tm = jnp.transpose(embedded, (1, 0, 2))               # (T, B, H)
    emb_tm = jnp.pad(emb_tm, ((0, 0), (0, Bp - B), (0, 0)))   # (T, Bp, H)
    x_flat = emb_tm.reshape(T * Bp, H).astype(jnp.bfloat16)

    wih_t = jnp.transpose(w_ih).astype(jnp.bfloat16)          # (H, 3H)
    whh_t = jnp.transpose(w_hh).astype(jnp.bfloat16)          # (H, 3H)
    # Fold b_hh into the precomputed gates for r/z; keep b_hh_n separate since
    # the n gate needs r * (W_hn h + b_hn).
    bias3 = jnp.concatenate([b_ih[:2 * H] + b_hh[:2 * H], b_ih[2 * H:]])
    bias3 = bias3.reshape(1, 3 * H).astype(jnp.float32)
    bhh_n = b_hh[2 * H:].reshape(1, H).astype(jnp.float32)

    vmem = pl.BlockSpec(memory_space=pltpu.MemorySpace.VMEM)  # full block, no pipelining
    h_last = pl.pallas_call(
        gru_kernel,
        out_shape=jax.ShapeDtypeStruct((Bp, H), jnp.float32),
        in_specs=[vmem] * 5,
        out_specs=vmem,
        scratch_shapes=[pltpu.VMEM((T * Bp, 3 * H), jnp.float32)],  # hoisted gates
    )(x_flat, wih_t, whh_t, bias3, bhh_n)

    # Final Linear(hidden, 1) on the lane-dense hidden state, padded rows dropped.
    logits = h_last[:B] @ w_out.T.astype(jnp.float32) + b_out.astype(jnp.float32)
    return logits.reshape(-1)                                 # (B,)


def reference_forward(tokens, params):
    """Pure-JAX f32 reference mirroring torch.nn.GRU + Linear."""
    emb_table = params["embedding"]
    H = emb_table.shape[1]
    embedded = emb_table[tokens].astype(jnp.float32)          # (B, T, H)
    B = embedded.shape[0]

    w_ih, w_hh = params["w_ih"], params["w_hh"]
    b_ih, b_hh = params["b_ih"], params["b_hh"]

    def step(h, x_t):
        gi = x_t @ w_ih.T + b_ih
        gh = h @ w_hh.T + b_hh
        i_r, i_z, i_n = jnp.split(gi, 3, axis=-1)
        h_r, h_z, h_n = jnp.split(gh, 3, axis=-1)
        r = jax.nn.sigmoid(i_r + h_r)
        z = jax.nn.sigmoid(i_z + h_z)
        n = jnp.tanh(i_n + r * h_n)
        return (1.0 - z) * n + z * h, None

    h0 = jnp.zeros((B, H), jnp.float32)
    x_tm = jnp.transpose(embedded, (1, 0, 2))                 # (T, B, H)
    h_last, _ = lax.scan(step, h0, x_tm)
    return (h_last @ params["w_out"].T + params["b_out"]).reshape(-1)


def init_params(key, vocab_size, hidden_size):
    kemb, kwi, kwh, kbi, kbh, kwo, kbo = jax.random.split(key, 7)
    bound = 1.0 / jnp.sqrt(hidden_size)
    return {
        "embedding": jax.random.normal(kemb, (vocab_size, hidden_size), jnp.float32),
        "w_ih": jax.random.uniform(kwi, (3 * hidden_size, hidden_size),
                                   jnp.float32, -bound, bound),
        "w_hh": jax.random.uniform(kwh, (3 * hidden_size, hidden_size),
                                   jnp.float32, -bound, bound),
        "b_ih": jax.random.uniform(kbi, (3 * hidden_size,), jnp.float32, -bound, bound),
        "b_hh": jax.random.uniform(kbh, (3 * hidden_size,), jnp.float32, -bound, bound),
        "w_out": jax.random.uniform(kwo, (1, hidden_size), jnp.float32, -bound, bound),
        "b_out": jax.random.uniform(kbo, (1,), jnp.float32, -bound, bound),
    }


if __name__ == "__main__":
    VOCAB = 50
    HIDDEN = 128     # matches the module's hidden_size
    BATCH = 4        # padded to 8 inside the wrapper
    SEQ = 8

    key = jax.random.PRNGKey(0)
    kp, kt = jax.random.split(key)
    params = init_params(kp, VOCAB, HIDDEN)
    tokens = jax.random.randint(kt, (BATCH, SEQ), 0, VOCAB, dtype=jnp.int32)

    out = jax.block_until_ready(rnn_classifier_forward(tokens, params))
    ref = jax.block_until_ready(reference_forward(tokens, params))

    assert out.shape == (BATCH,), out.shape
    # bf16 MXU operands (f32 accumulation) vs a pure-f32 reference -> relaxed tol.
    assert jnp.allclose(out, ref, atol=5e-2, rtol=5e-2), (out, ref)
    print("KERNEL_OK")
</pallas_src>

<mosaic_0001>
module attributes {stable_mosaic.version = 11 : i64} {
  func.func @gru_kernel(%arg0: memref<64x128xbf16, #tpu.memory_space<vmem>>, %arg1: memref<128x384xbf16, #tpu.memory_space<vmem>>, %arg2: memref<128x384xbf16, #tpu.memory_space<vmem>>, %arg3: memref<1x384xf32, #tpu.memory_space<vmem>>, %arg4: memref<1x128xf32, #tpu.memory_space<vmem>>, %arg5: memref<8x128xf32, #tpu.memory_space<vmem>>, %arg6: memref<64x384xf32, #tpu.memory_space<vmem>>) attributes {dimension_semantics = [], scalar_prefetch = 0 : i64, scratch_operands = 1 : i64, tpu.core_type = #tpu.core_type<tc>} {
    %c0 = arith.constant 0 : index
    %c0_0 = arith.constant 0 : index
    %0 = vector.load %arg0[%c0, %c0_0] : memref<64x128xbf16, #tpu.memory_space<vmem>>, vector<64x128xbf16>
    %c0_1 = arith.constant 0 : index
    %c0_2 = arith.constant 0 : index
    %1 = vector.load %arg1[%c0_1, %c0_2] : memref<128x384xbf16, #tpu.memory_space<vmem>>, vector<128x384xbf16>
    %cst = arith.constant dense<0.000000e+00> : vector<64x384xf32>
    %2 = tpu.matmul %0, %1, %cst {dimension_numbers = #tpu.dot_dimension_numbers<[1], [0], [0], [1], [0, 0, 1, 1], [], []>} : vector<64x128xbf16>, vector<128x384xbf16>, vector<64x384xf32> -> vector<64x384xf32>
    %c0_3 = arith.constant 0 : index
    %c0_4 = arith.constant 0 : index
    %3 = vector.load %arg3[%c0_3, %c0_4] : memref<1x384xf32, #tpu.memory_space<vmem>>, vector<1x384xf32>
    %4 = vector.broadcast %3 : vector<1x384xf32> to vector<64x384xf32>
    %5 = arith.addf %2, %4 : vector<64x384xf32>
    %c0_5 = arith.constant 0 : index
    %c0_6 = arith.constant 0 : index
    %6 = vector.load %arg6[%c0_5, %c0_6] : memref<64x384xf32, #tpu.memory_space<vmem>>, vector<64x384xf32>
    tpu.vector_store %arg6[%c0_5, %c0_6], %5 {strides = array<i32>} : memref<64x384xf32, #tpu.memory_space<vmem>>, vector<64x384xf32>,
    %c0_7 = arith.constant 0 : index
    %c0_8 = arith.constant 0 : index
    %7 = vector.load %arg2[%c0_7, %c0_8] : memref<128x384xbf16, #tpu.memory_space<vmem>>, vector<128x384xbf16>
    %c0_9 = arith.constant 0 : index
    %c0_10 = arith.constant 0 : index
    %8 = vector.load %arg4[%c0_9, %c0_10] : memref<1x128xf32, #tpu.memory_space<vmem>>, vector<1x128xf32>
    %9 = vector.shape_cast %8 : vector<1x128xf32> to vector<1x128xf32>
    %10 = vector.broadcast %9 : vector<1x128xf32> to vector<8x128xf32>
    %cst_11 = arith.constant 0.000000e+00 : f32
    %11 = vector.broadcast %cst_11 : f32 to vector<8x128xf32>
    %c0_i32 = arith.constant 0 : i32
    %c8_i32 = arith.constant 8 : i32
    %12 = arith.muli %c0_i32, %c8_i32 : i32
    %13 = tpu.assume_multiple %12, 8 : i32
    %14 = arith.index_cast %13 : i32 to index
    %c0_12 = arith.constant 0 : index
    %15 = vector.load %arg6[%14, %c0_12] : memref<64x384xf32, #tpu.memory_space<vmem>>, vector<8x384xf32>
    %16 = arith.truncf %11 : vector<8x128xf32> to vector<8x128xbf16>
    %cst_13 = arith.constant dense<0.000000e+00> : vector<8x384xf32>
    %17 = tpu.matmul %16, %7, %cst_13 {dimension_numbers = #tpu.dot_dimension_numbers<[1], [0], [0], [1], [0, 0, 1, 1], [], []>} : vector<8x128xbf16>, vector<128x384xbf16>, vector<8x384xf32> -> vector<8x384xf32>
    %18 = vector.extract_strided_slice %15 {offsets = [0, 0], sizes = [8, 128], strides = [1, 1]} : vector<8x384xf32> to vector<8x128xf32>
    %19 = vector.extract_strided_slice %17 {offsets = [0, 0], sizes = [8, 128], strides = [1, 1]} : vector<8x384xf32> to vector<8x128xf32>
    %20 = arith.addf %18, %19 : vector<8x128xf32>
    %21 = arith.negf %20 : vector<8x128xf32>
    %22 = math.exp %21 : vector<8x128xf32>
    %cst_14 = arith.constant 1.000000e+00 : f32
    %23 = vector.broadcast %cst_14 : f32 to vector<8x128xf32>
    %24 = arith.addf %23, %22 : vector<8x128xf32>
    %25 = arith.divf %23, %24 : vector<8x128xf32>
    %26 = vector.extract_strided_slice %15 {offsets = [0, 128], sizes = [8, 128], strides = [1, 1]} : vector<8x384xf32> to vector<8x128xf32>
    %27 = vector.extract_strided_slice %17 {offsets = [0, 128], sizes = [8, 128], strides = [1, 1]} : vector<8x384xf32> to vector<8x128xf32>
    %28 = arith.addf %26, %27 : vector<8x128xf32>
    %29 = arith.negf %28 : vector<8x128xf32>
    %30 = math.exp %29 : vector<8x128xf32>
    %cst_15 = arith.constant 1.000000e+00 : f32
    %31 = vector.broadcast %cst_15 : f32 to vector<8x128xf32>
    %32 = arith.addf %31, %30 : vector<8x128xf32>
    %33 = arith.divf %31, %32 : vector<8x128xf32>
    %34 = vector.extract_strided_slice %15 {offsets = [0, 256], sizes = [8, 128], strides = [1, 1]} : vector<8x384xf32> to vector<8x128xf32>
    %35 = vector.extract_strided_slice %17 {offsets = [0, 256], sizes = [8, 128], strides = [1, 1]} : vector<8x384xf32> to vector<8x128xf32>
    %36 = arith.addf %35, %10 : vector<8x128xf32>
    %37 = arith.mulf %25, %36 : vector<8x128xf32>
    %38 = arith.addf %34, %37 : vector<8x128xf32>
    %39 = math.tanh %38 : vector<8x128xf32>
    %cst_16 = arith.constant 1.000000e+00 : f32
    %40 = vector.broadcast %cst_16 : f32 to vector<8x128xf32>
    %41 = arith.subf %40, %33 : vector<8x128xf32>
    %42 = arith.mulf %41, %39 : vector<8x128xf32>
    %43 = arith.mulf %33, %11 : vector<8x128xf32>
    %44 = arith.addf %42, %43 : vector<8x128xf32>
    %c1_i32 = arith.constant 1 : i32
    %c8_i32_17 = arith.constant 8 : i32
    %45 = arith.muli %c1_i32, %c8_i32_17 : i32
    %46 = tpu.assume_multiple %45, 8 : i32
    %47 = arith.index_cast %46 : i32 to index
    %c0_18 = arith.constant 0 : index
    %48 = vector.load %arg6[%47, %c0_18] : memref<64x384xf32, #tpu.memory_space<vmem>>, vector<8x384xf32>
    %49 = arith.truncf %44 : vector<8x128xf32> to vector<8x128xbf16>
    %cst_19 = arith.constant dense<0.000000e+00> : vector<8x384xf32>
    %50 = tpu.matmul %49, %7, %cst_19 {dimension_numbers = #tpu.dot_dimension_numbers<[1], [0], [0], [1], [0, 0, 1, 1], [], []>} : vector<8x128xbf16>, vector<128x384xbf16>, vector<8x384xf32> -> vector<8x384xf32>
    %51 = vector.extract_strided_slice %48 {offsets = [0, 0], sizes = [8, 128], strides = [1, 1]} : vector<8x384xf32> to vector<8x128xf32>
    %52 = vector.extract_strided_slice %50 {offsets = [0, 0], sizes = [8, 128], strides = [1, 1]} : vector<8x384xf32> to vector<8x128xf32>
    %53 = arith.addf %51, %52 : vector<8x128xf32>
    %54 = arith.negf %53 : vector<8x128xf32>
    %55 = math.exp %54 : vector<8x128xf32>
    %cst_20 = arith.constant 1.000000e+00 : f32
    %56 = vector.broadcast %cst_20 : f32 to vector<8x128xf32>
    %57 = arith.addf %56, %55 : vector<8x128xf32>
    %58 = arith.divf %56, %57 : vector<8x128xf32>
    %59 = vector.extract_strided_slice %48 {offsets = [0, 128], sizes = [8, 128], strides = [1, 1]} : vector<8x384xf32> to vector<8x128xf32>
    %60 = vector.extract_strided_slice %50 {offsets = [0, 128], sizes = [8, 128], strides = [1, 1]} : vector<8x384xf32> to vector<8x128xf32>
    %61 = arith.addf %59, %60 : vector<8x128xf32>
    %62 = arith.negf %61 : vector<8x128xf32>
    %63 = math.exp %62 : vector<8x128xf32>
    %cst_21 = arith.constant 1.000000e+00 : f32
    %64 = vector.broadcast %cst_21 : f32 to vector<8x128xf32>
    %65 = arith.addf %64, %63 : vector<8x128xf32>
    %66 = arith.divf %64, %65 : vector<8x128xf32>
    %67 = vector.extract_strided_slice %48 {offsets = [0, 256], sizes = [8, 128], strides = [1, 1]} : vector<8x384xf32> to vector<8x128xf32>
    %68 = vector.extract_strided_slice %50 {offsets = [0, 256], sizes = [8, 128], strides = [1, 1]} : vector<8x384xf32> to vector<8x128xf32>
    %69 = arith.addf %68, %10 : vector<8x128xf32>
    %70 = arith.mulf %58, %69 : vector<8x128xf32>
    %71 = arith.addf %67, %70 : vector<8x128xf32>
    %72 = math.tanh %71 : vector<8x128xf32>
    %cst_22 = arith.constant 1.000000e+00 : f32
    %73 = vector.broadcast %cst_22 : f32 to vector<8x128xf32>
    %74 = arith.subf %73, %66 : vector<8x128xf32>
    %75 = arith.mulf %74, %72 : vector<8x128xf32>
    %76 = arith.mulf %66, %44 : vector<8x128xf32>
    %77 = arith.addf %75, %76 : vector<8x128xf32>
    %c2_i32 = arith.constant 2 : i32
    %c8_i32_23 = arith.constant 8 : i32
    %78 = arith.muli %c2_i32, %c8_i32_23 : i32
    %79 = tpu.assume_multiple %78, 8 : i32
    %80 = arith.index_cast %79 : i32 to index
    %c0_24 = arith.constant 0 : index
    %81 = vector.load %arg6[%80, %c0_24] : memref<64x384xf32, #tpu.memory_space<vmem>>, vector<8x384xf32>
    %82 = arith.truncf %77 : vector<8x128xf32> to vector<8x128xbf16>
    %cst_25 = arith.constant dense<0.000000e+00> : vector<8x384xf32>
    %83 = tpu.matmul %82, %7, %cst_25 {dimension_numbers = #tpu.dot_dimension_numbers<[1], [0], [0], [1], [0, 0, 1, 1], [], []>} : vector<8x128xbf16>, vector<128x384xbf16>, vector<8x384xf32> -> vector<8x384xf32>
    %84 = vector.extract_strided_slice %81 {offsets = [0, 0], sizes = [8, 128], strides = [1, 1]} : vector<8x384xf32> to vector<8x128xf32>
    %85 = vector.extract_strided_slice %83 {offsets = [0, 0], sizes = [8, 128], strides = [1, 1]} : vector<8x384xf32> to vector<8x128xf32>
    %86 = arith.addf %84, %85 : vector<8x128xf32>
    %87 = arith.negf %86 : vector<8x128xf32>
    %88 = math.exp %87 : vector<8x128xf32>
    %cst_26 = arith.constant 1.000000e+00 : f32
    %89 = vector.broadcast %cst_26 : f32 to vector<8x128xf32>
    %90 = arith.addf %89, %88 : vector<8x128xf32>
    %91 = arith.divf %89, %90 : vector<8x128xf32>
    %92 = vector.extract_strided_slice %81 {offsets = [0, 128], sizes = [8, 128], strides = [1, 1]} : vector<8x384xf32> to vector<8x128xf32>
    %93 = vector.extract_strided_slice %83 {offsets = [0, 128], sizes = [8, 128], strides = [1, 1]} : vector<8x384xf32> to vector<8x128xf32>
    %94 = arith.addf %92, %93 : vector<8x128xf32>
    %95 = arith.negf %94 : vector<8x128xf32>
    %96 = math.exp %95 : vector<8x128xf32>
    %cst_27 = arith.constant 1.000000e+00 : f32
    %97 = vector.broadcast %cst_27 : f32 to vector<8x128xf32>
    %98 = arith.addf %97, %96 : vector<8x128xf32>
    %99 = arith.divf %97, %98 : vector<8x128xf32>
    %100 = vector.extract_strided_slice %81 {offsets = [0, 256], sizes = [8, 128], strides = [1, 1]} : vector<8x384xf32> to vector<8x128xf32>
    %101 = vector.extract_strided_slice %83 {offsets = [0, 256], sizes = [8, 128], strides = [1, 1]} : vector<8x384xf32> to vector<8x128xf32>
    %102 = arith.addf %101, %10 : vector<8x128xf32>
    %103 = arith.mulf %91, %102 : vector<8x128xf32>
    %104 = arith.addf %100, %103 : vector<8x128xf32>
    %105 = math.tanh %104 : vector<8x128xf32>
    %cst_28 = arith.constant 1.000000e+00 : f32
    %106 = vector.broadcast %cst_28 : f32 to vector<8x128xf32>
    %107 = arith.subf %106, %99 : vector<8x128xf32>
    %108 = arith.mulf %107, %105 : vector<8x128xf32>
    %109 = arith.mulf %99, %77 : vector<8x128xf32>
    %110 = arith.addf %108, %109 : vector<8x128xf32>
    %c3_i32 = arith.constant 3 : i32
    %c8_i32_29 = arith.constant 8 : i32
    %111 = arith.muli %c3_i32, %c8_i32_29 : i32
    %112 = tpu.assume_multiple %111, 8 : i32
    %113 = arith.index_cast %112 : i32 to index
    %c0_30 = arith.constant 0 : index
    %114 = vector.load %arg6[%113, %c0_30] : memref<64x384xf32, #tpu.memory_space<vmem>>, vector<8x384xf32>
    %115 = arith.truncf %110 : vector<8x128xf32> to vector<8x128xbf16>
    %cst_31 = arith.constant dense<0.000000e+00> : vector<8x384xf32>
    %116 = tpu.matmul %115, %7, %cst_31 {dimension_numbers = #tpu.dot_dimension_numbers<[1], [0], [0], [1], [0, 0, 1, 1], [], []>} : vector<8x128xbf16>, vector<128x384xbf16>, vector<8x384xf32> -> vector<8x384xf32>
    %117 = vector.extract_strided_slice %114 {offsets = [0, 0], sizes = [8, 128], strides = [1, 1]} : vector<8x384xf32> to vector<8x128xf32>
    %118 = vector.extract_strided_slice %116 {offsets = [0, 0], sizes = [8, 128], strides = [1, 1]} : vector<8x384xf32> to vector<8x128xf32>
    %119 = arith.addf %117, %118 : vector<8x128xf32>
    %120 = arith.negf %119 : vector<8x128xf32>
    %121 = math.exp %120 : vector<8x128xf32>
    %cst_32 = arith.constant 1.000000e+00 : f32
    %122 = vector.broadcast %cst_32 : f32 to vector<8x128xf32>
    %123 = arith.addf %122, %121 : vector<8x128xf32>
    %124 = arith.divf %122, %123 : vector<8x128xf32>
    %125 = vector.extract_strided_slice %114 {offsets = [0, 128], sizes = [8, 128], strides = [1, 1]} : vector<8x384xf32> to vector<8x128xf32>
    %126 = vector.extract_strided_slice %116 {offsets = [0, 128], sizes = [8, 128], strides = [1, 1]} : vector<8x384xf32> to vector<8x128xf32>
    %127 = arith.addf %125, %126 : vector<8x128xf32>
    %128 = arith.negf %127 : vector<8x128xf32>
    %129 = math.exp %128 : vector<8x128xf32>
    %cst_33 = arith.constant 1.000000e+00 : f32
    %130 = vector.broadcast %cst_33 : f32 to vector<8x128xf32>
    %131 = arith.addf %130, %129 : vector<8x128xf32>
    %132 = arith.divf %130, %131 : vector<8x128xf32>
    %133 = vector.extract_strided_slice %114 {offsets = [0, 256], sizes = [8, 128], strides = [1, 1]} : vector<8x384xf32> to vector<8x128xf32>
    %134 = vector.extract_strided_slice %116 {offsets = [0, 256], sizes = [8, 128], strides = [1, 1]} : vector<8x384xf32> to vector<8x128xf32>
    %135 = arith.addf %134, %10 : vector<8x128xf32>
    %136 = arith.mulf %124, %135 : vector<8x128xf32>
    %137 = arith.addf %133, %136 : vector<8x128xf32>
    %138 = math.tanh %137 : vector<8x128xf32>
    %cst_34 = arith.constant 1.000000e+00 : f32
    %139 = vector.broadcast %cst_34 : f32 to vector<8x128xf32>
    %140 = arith.subf %139, %132 : vector<8x128xf32>
    %141 = arith.mulf %140, %138 : vector<8x128xf32>
    %142 = arith.mulf %132, %110 : vector<8x128xf32>
    %143 = arith.addf %141, %142 : vector<8x128xf32>
    %c4_i32 = arith.constant 4 : i32
    %c8_i32_35 = arith.constant 8 : i32
    %144 = arith.muli %c4_i32, %c8_i32_35 : i32
    %145 = tpu.assume_multiple %144, 8 : i32
    %146 = arith.index_cast %145 : i32 to index
    %c0_36 = arith.constant 0 : index
    %147 = vector.load %arg6[%146, %c0_36] : memref<64x384xf32, #tpu.memory_space<vmem>>, vector<8x384xf32>
    %148 = arith.truncf %143 : vector<8x128xf32> to vector<8x128xbf16>
    %cst_37 = arith.constant dense<0.000000e+00> : vector<8x384xf32>
    %149 = tpu.matmul %148, %7, %cst_37 {dimension_numbers = #tpu.dot_dimension_numbers<[1], [0], [0], [1], [0, 0, 1, 1], [], []>} : vector<8x128xbf16>, vector<128x384xbf16>, vector<8x384xf32> -> vector<8x384xf32>
    %150 = vector.extract_strided_slice %147 {offsets = [0, 0], sizes = [8, 128], strides = [1, 1]} : vector<8x384xf32> to vector<8x128xf32>
    %151 = vector.extract_strided_slice %149 {offsets = [0, 0], sizes = [8, 128], strides = [1, 1]} : vector<8x384xf32> to vector<8x128xf32>
    %152 = arith.addf %150, %151 : vector<8x128xf32>
    %153 = arith.negf %152 : vector<8x128xf32>
    %154 = math.exp %153 : vector<8x128xf32>
    %cst_38 = arith.constant 1.000000e+00 : f32
    %155 = vector.broadcast %cst_38 : f32 to vector<8x128xf32>
    %156 = arith.addf %155, %154 : vector<8x128xf32>
    %157 = arith.divf %155, %156 : vector<8x128xf32>
    %158 = vector.extract_strided_slice %147 {offsets = [0, 128], sizes = [8, 128], strides = [1, 1]} : vector<8x384xf32> to vector<8x128xf32>
    %159 = vector.extract_strided_slice %149 {offsets = [0, 128], sizes = [8, 128], strides = [1, 1]} : vector<8x384xf32> to vector<8x128xf32>
    %160 = arith.addf %158, %159 : vector<8x128xf32>
    %161 = arith.negf %160 : vector<8x128xf32>
    %162 = math.exp %161 : vector<8x128xf32>
    %cst_39 = arith.constant 1.000000e+00 : f32
    %163 = vector.broadcast %cst_39 : f32 to vector<8x128xf32>
    %164 = arith.addf %163, %162 : vector<8x128xf32>
    %165 = arith.divf %163, %164 : vector<8x128xf32>
    %166 = vector.extract_strided_slice %147 {offsets = [0, 256], sizes = [8, 128], strides = [1, 1]} : vector<8x384xf32> to vector<8x128xf32>
    %167 = vector.extract_strided_slice %149 {offsets = [0, 256], sizes = [8, 128], strides = [1, 1]} : vector<8x384xf32> to vector<8x128xf32>
    %168 = arith.addf %167, %10 : vector<8x128xf32>
    %169 = arith.mulf %157, %168 : vector<8x128xf32>
    %170 = arith.addf %166, %169 : vector<8x128xf32>
    %171 = math.tanh %170 : vector<8x128xf32>
    %cst_40 = arith.constant 1.000000e+00 : f32
    %172 = vector.broadcast %cst_40 : f32 to vector<8x128xf32>
    %173 = arith.subf %172, %165 : vector<8x128xf32>
    %174 = arith.mulf %173, %171 : vector<8x128xf32>
    %175 = arith.mulf %165, %143 : vector<8x128xf32>
    %176 = arith.addf %174, %175 : vector<8x128xf32>
    %c5_i32 = arith.constant 5 : i32
    %c8_i32_41 = arith.constant 8 : i32
    %177 = arith.muli %c5_i32, %c8_i32_41 : i32
    %178 = tpu.assume_multiple %177, 8 : i32
    %179 = arith.index_cast %178 : i32 to index
    %c0_42 = arith.constant 0 : index
    %180 = vector.load %arg6[%179, %c0_42] : memref<64x384xf32, #tpu.memory_space<vmem>>, vector<8x384xf32>
    %181 = arith.truncf %176 : vector<8x128xf32> to vector<8x128xbf16>
    %cst_43 = arith.constant dense<0.000000e+00> : vector<8x384xf32>
    %182 = tpu.matmul %181, %7, %cst_43 {dimension_numbers = #tpu.dot_dimension_numbers<[1], [0], [0], [1], [0, 0, 1, 1], [], []>} : vector<8x128xbf16>, vector<128x384xbf16>, vector<8x384xf32> -> vector<8x384xf32>
    %183 = vector.extract_strided_slice %180 {offsets = [0, 0], sizes = [8, 128], strides = [1, 1]} : vector<8x384xf32> to vector<8x128xf32>
    %184 = vector.extract_strided_slice %182 {offsets = [0, 0], sizes = [8, 128], strides = [1, 1]} : vector<8x384xf32> to vector<8x128xf32>
    %185 = arith.addf %183, %184 : vector<8x128xf32>
    %186 = arith.negf %185 : vector<8x128xf32>
    %187 = math.exp %186 : vector<8x128xf32>
    %cst_44 = arith.constant 1.000000e+00 : f32
    %188 = vector.broadcast %cst_44 : f32 to vector<8x128xf32>
    %189 = arith.addf %188, %187 : vector<8x128xf32>
    %190 = arith.divf %188, %189 : vector<8x128xf32>
    %191 = vector.extract_strided_slice %180 {offsets = [0, 128], sizes = [8, 128], strides = [1, 1]} : vector<8x384xf32> to vector<8x128xf32>
    %192 = vector.extract_strided_slice %182 {offsets = [0, 128], sizes = [8, 128], strides = [1, 1]} : vector<8x384xf32> to vector<8x128xf32>
    %193 = arith.addf %191, %192 : vector<8x128xf32>
    %194 = arith.negf %193 : vector<8x128xf32>
    %195 = math.exp %194 : vector<8x128xf32>
    %cst_45 = arith.constant 1.000000e+00 : f32
    %196 = vector.broadcast %cst_45 : f32 to vector<8x128xf32>
    %197 = arith.addf %196, %195 : vector<8x128xf32>
    %198 = arith.divf %196, %197 : vector<8x128xf32>
    %199 = vector.extract_strided_slice %180 {offsets = [0, 256], sizes = [8, 128], strides = [1, 1]} : vector<8x384xf32> to vector<8x128xf32>
    %200 = vector.extract_strided_slice %182 {offsets = [0, 256], sizes = [8, 128], strides = [1, 1]} : vector<8x384xf32> to vector<8x128xf32>
    %201 = arith.addf %200, %10 : vector<8x128xf32>
    %202 = arith.mulf %190, %201 : vector<8x128xf32>
    %203 = arith.addf %199, %202 : vector<8x128xf32>
    %204 = math.tanh %203 : vector<8x128xf32>
    %cst_46 = arith.constant 1.000000e+00 : f32
    %205 = vector.broadcast %cst_46 : f32 to vector<8x128xf32>
    %206 = arith.subf %205, %198 : vector<8x128xf32>
    %207 = arith.mulf %206, %204 : vector<8x128xf32>
    %208 = arith.mulf %198, %176 : vector<8x128xf32>
    %209 = arith.addf %207, %208 : vector<8x128xf32>
    %c6_i32 = arith.constant 6 : i32
    %c8_i32_47 = arith.constant 8 : i32
    %210 = arith.muli %c6_i32, %c8_i32_47 : i32
    %211 = tpu.assume_multiple %210, 8 : i32
    %212 = arith.index_cast %211 : i32 to index
    %c0_48 = arith.constant 0 : index
    %213 = vector.load %arg6[%212, %c0_48] : memref<64x384xf32, #tpu.memory_space<vmem>>, vector<8x384xf32>
    %214 = arith.truncf %209 : vector<8x128xf32> to vector<8x128xbf16>
    %cst_49 = arith.constant dense<0.000000e+00> : vector<8x384xf32>
    %215 = tpu.matmul %214, %7, %cst_49 {dimension_numbers = #tpu.dot_dimension_numbers<[1], [0], [0], [1], [0, 0, 1, 1], [], []>} : vector<8x128xbf16>, vector<128x384xbf16>, vector<8x384xf32> -> vector<8x384xf32>
    %216 = vector.extract_strided_slice %213 {offsets = [0, 0], sizes = [8, 128], strides = [1, 1]} : vector<8x384xf32> to vector<8x128xf32>
    %217 = vector.extract_strided_slice %215 {offsets = [0, 0], sizes = [8, 128], strides = [1, 1]} : vector<8x384xf32> to vector<8x128xf32>
    %218 = arith.addf %216, %217 : vector<8x128xf32>
    %219 = arith.negf %218 : vector<8x128xf32>
    %220 = math.exp %219 : vector<8x128xf32>
    %cst_50 = arith.constant 1.000000e+00 : f32
    %221 = vector.broadcast %cst_50 : f32 to vector<8x128xf32>
    %222 = arith.addf %221, %220 : vector<8x128xf32>
    %223 = arith.divf %221, %222 : vector<8x128xf32>
    %224 = vector.extract_strided_slice %213 {offsets = [0, 128], sizes = [8, 128], strides = [1, 1]} : vector<8x384xf32> to vector<8x128xf32>
    %225 = vector.extract_strided_slice %215 {offsets = [0, 128], sizes = [8, 128], strides = [1, 1]} : vector<8x384xf32> to vector<8x128xf32>
    %226 = arith.addf %224, %225 : vector<8x128xf32>
    %227 = arith.negf %226 : vector<8x128xf32>
    %228 = math.exp %227 : vector<8x128xf32>
    %cst_51 = arith.constant 1.000000e+00 : f32
    %229 = vector.broadcast %cst_51 : f32 to vector<8x128xf32>
    %230 = arith.addf %229, %228 : vector<8x128xf32>
    %231 = arith.divf %229, %230 : vector<8x128xf32>
    %232 = vector.extract_strided_slice %213 {offsets = [0, 256], sizes = [8, 128], strides = [1, 1]} : vector<8x384xf32> to vector<8x128xf32>
    %233 = vector.extract_strided_slice %215 {offsets = [0, 256], sizes = [8, 128], strides = [1, 1]} : vector<8x384xf32> to vector<8x128xf32>
    %234 = arith.addf %233, %10 : vector<8x128xf32>
    %235 = arith.mulf %223, %234 : vector<8x128xf32>
    %236 = arith.addf %232, %235 : vector<8x128xf32>
    %237 = math.tanh %236 : vector<8x128xf32>
    %cst_52 = arith.constant 1.000000e+00 : f32
    %238 = vector.broadcast %cst_52 : f32 to vector<8x128xf32>
    %239 = arith.subf %238, %231 : vector<8x128xf32>
    %240 = arith.mulf %239, %237 : vector<8x128xf32>
    %241 = arith.mulf %231, %209 : vector<8x128xf32>
    %242 = arith.addf %240, %241 : vector<8x128xf32>
    %c7_i32 = arith.constant 7 : i32
    %c8_i32_53 = arith.constant 8 : i32
    %243 = arith.muli %c7_i32, %c8_i32_53 : i32
    %244 = tpu.assume_multiple %243, 8 : i32
    %245 = arith.index_cast %244 : i32 to index
    %c0_54 = arith.constant 0 : index
    %246 = vector.load %arg6[%245, %c0_54] : memref<64x384xf32, #tpu.memory_space<vmem>>, vector<8x384xf32>
    %247 = arith.truncf %242 : vector<8x128xf32> to vector<8x128xbf16>
    %cst_55 = arith.constant dense<0.000000e+00> : vector<8x384xf32>
    %248 = tpu.matmul %247, %7, %cst_55 {dimension_numbers = #tpu.dot_dimension_numbers<[1], [0], [0], [1], [0, 0, 1, 1], [], []>} : vector<8x128xbf16>, vector<128x384xbf16>, vector<8x384xf32> -> vector<8x384xf32>
    %249 = vector.extract_strided_slice %246 {offsets = [0, 0], sizes = [8, 128], strides = [1, 1]} : vector<8x384xf32> to vector<8x128xf32>
    %250 = vector.extract_strided_slice %248 {offsets = [0, 0], sizes = [8, 128], strides = [1, 1]} : vector<8x384xf32> to vector<8x128xf32>
    %251 = arith.addf %249, %250 : vector<8x128xf32>
    %252 = arith.negf %251 : vector<8x128xf32>
    %253 = math.exp %252 : vector<8x128xf32>
    %cst_56 = arith.constant 1.000000e+00 : f32
    %254 = vector.broadcast %cst_56 : f32 to vector<8x128xf32>
    %255 = arith.addf %254, %253 : vector<8x128xf32>
    %256 = arith.divf %254, %255 : vector<8x128xf32>
    %257 = vector.extract_strided_slice %246 {offsets = [0, 128], sizes = [8, 128], strides = [1, 1]} : vector<8x384xf32> to vector<8x128xf32>
    %258 = vector.extract_strided_slice %248 {offsets = [0, 128], sizes = [8, 128], strides = [1, 1]} : vector<8x384xf32> to vector<8x128xf32>
    %259 = arith.addf %257, %258 : vector<8x128xf32>
    %260 = arith.negf %259 : vector<8x128xf32>
    %261 = math.exp %260 : vector<8x128xf32>
    %cst_57 = arith.constant 1.000000e+00 : f32
    %262 = vector.broadcast %cst_57 : f32 to vector<8x128xf32>
    %263 = arith.addf %262, %261 : vector<8x128xf32>
    %264 = arith.divf %262, %263 : vector<8x128xf32>
    %265 = vector.extract_strided_slice %246 {offsets = [0, 256], sizes = [8, 128], strides = [1, 1]} : vector<8x384xf32> to vector<8x128xf32>
    %266 = vector.extract_strided_slice %248 {offsets = [0, 256], sizes = [8, 128], strides = [1, 1]} : vector<8x384xf32> to vector<8x128xf32>
    %267 = arith.addf %266, %10 : vector<8x128xf32>
    %268 = arith.mulf %256, %267 : vector<8x128xf32>
    %269 = arith.addf %265, %268 : vector<8x128xf32>
    %270 = math.tanh %269 : vector<8x128xf32>
    %cst_58 = arith.constant 1.000000e+00 : f32
    %271 = vector.broadcast %cst_58 : f32 to vector<8x128xf32>
    %272 = arith.subf %271, %264 : vector<8x128xf32>
    %273 = arith.mulf %272, %270 : vector<8x128xf32>
    %274 = arith.mulf %264, %242 : vector<8x128xf32>
    %275 = arith.addf %273, %274 : vector<8x128xf32>
    %c8_i32_59 = arith.constant 8 : i32
    %c0_60 = arith.constant 0 : index
    %c0_61 = arith.constant 0 : index
    %276 = vector.load %arg5[%c0_60, %c0_61] : memref<8x128xf32, #tpu.memory_space<vmem>>, vector<8x128xf32>
    tpu.vector_store %arg5[%c0_60, %c0_61], %275 {strides = array<i32>} : memref<8x128xf32, #tpu.memory_space<vmem>>, vector<8x128xf32>,
    return
  }
}

</mosaic_0001>

<bundles_post_ra>
// kernel: tpu_custom_call.1
= control target key start
LH: loop header
LB: loop body
LE: loop exit
PB: predicated region body
PF: predicated region fallthrough
CT: control target
= control target key end

     0   :  { %10 = vsyncpa [#allocation4], 0  ;;  %s2257_s0 = inlined_call_operand.hbm [shape: bf16[64,128], index: 0, kind: input, shape index: {}]   ;;  %s2258_s1 = inlined_call_operand.hbm [shape: bf16[128,384], index: 1, kind: input, shape index: {}]   ;;  %s2259_s2 = inlined_call_operand.hbm [shape: bf16[128,384], index: 2, kind: input, shape index: {}]   ;;  %s2260_s3 = inlined_call_operand.hbm [shape: f32[1,384], index: 3, kind: input, shape index: {}]   ;;  %s2261_s4 = inlined_call_operand.vmem [shape: f32[1,128], index: 4, kind: input, shape index: {}]   ;;  %s2262_s5 = inlined_call_operand.hbm [shape: f32[8,128], index: 5, kind: output, shape index: {}]  }
   0x1   :  { %11 = vsyncpa [#allocation7], 0 }
   0x2   :  { %12 = vsyncpa [#allocation10], 0  ;;  %s31_s20 = sshll.u32 %s2258_s1, 4  ;;  %s32_s20 = int_to_ptr.hbm [resolvable:$true] %s31_s20 }
   0x3   :  { %13 = vsyncpa [#allocation5], 0  ;;  %s1832_s21 = smov [#allocation6]   ;;  %s18_s25 = sshll.u32 %s2257_s0, 4  ;;  %s19_s25 = int_to_ptr.hbm [resolvable:$true] %s18_s25 }
   0x4   :  { %s33_s22 = sshll.u32 %s1832_s21, 4  ;;  %s1833_s26 = smov 192   ;;  %s34_s22 = int_to_ptr.vmem [resolvable:$true] %s33_s22 }
   0x5   :  { %s1834_s27 = smov 12   ;;  %s1835_s28 = smov [#allocation3]  }
   0x6   :  { %39 = dma.hbm_to_vmem [thread:$0]  %s32_s20, 3072, %s34_s22, [#allocation7], %s1833_s26, %s1833_s26, %s1834_s27  }
   0x7   :  { %s20_s29 = sshll.u32 %s1835_s28, 4  ;;  %s1836_s30 = smov 64   ;;  %s21_s29 = int_to_ptr.vmem [resolvable:$true] %s20_s29 }
   0x8   :  { %s1837_s6 = smov 4   ;;  %s44_s8 = sshll.u32 %s2259_s2, 4  ;;  %s45_s8 = int_to_ptr.hbm [resolvable:$true] %s44_s8 }
   0x9   :  { %26 = dma.hbm_to_vmem [thread:$0]  %s19_s25, 512, %s21_s29, [#allocation4], %s1836_s30, %s1836_s30, %s1837_s6  }
   0xa   :  { %s1838_s9 = smov [#allocation8]   ;;  %s58_s12 = sshll.u32 %s2260_s3, 4  ;;  %s59_s12 = int_to_ptr.hbm [resolvable:$true] %s58_s12 }
   0xb   :  { %s46_s10 = sshll.u32 %s1838_s9, 4  ;;  %s1839_s13 = smov [#allocation9]   ;;  %s47_s10 = int_to_ptr.vmem [resolvable:$true] %s46_s10 }
   0xc   :  { %52 = dma.hbm_to_vmem [thread:$0]  %s45_s8, 3072, %s47_s10, [#allocation7], %s1833_s26, %s1833_s26, %s1834_s27  }
   0xd   :  { %s60_s14 = sshll.u32 %s1839_s13, 4  ;;  %s61_s14 = int_to_ptr.vmem [resolvable:$true] %s60_s14 }
   0xe   :  { %63 = dma.hbm_to_vmem [thread:$0]  %s59_s12, 48, %s61_s14, [#allocation10]  }
   0xf   :  { %1824 = dma.done.wait [#allocation4], 512  }
  0x10   :  { %1825 = vsyncadd [#allocation4], 4294966784 }
  0x11   :  { %1826 = dma.done.wait [#allocation7], 6144  }
  0x12   :  { %1827 = vsyncadd [#allocation7], 4294961152 }
  0x13   :  { %1828 = dma.done.wait [#allocation10], 48  }
  0x14   :  { %1829 = vsyncadd [#allocation10], 4294967248  ;;  %v1438_v0 = vld [vmem:[#allocation6 + $0xa8] sm:$0xf]  ;;  %v1586_v1 = vld [vmem:[#allocation6 + $0xb0] sm:$0xf0] }
  0x15   :  { %v1534_v2 = vld [vmem:[#allocation8 + $0xa8] sm:$0xf]  ;;  %v1439_v3 = vor.u32 %v1586_v1, %v1438_v0  ;;  %v1610_v4 = vld [vmem:[#allocation8 + $0xb0] sm:$0xf0]  ;;  %v1426_v5 = vld [vmem:[#allocation6 + $0x90] sm:$0xf] }
  0x16   :  { %v1583_v6 = vld [vmem:[#allocation6 + $0x98] sm:$0xf0]  ;;  %v1884_v7 = vor.u32 %v1610_v4, %v1534_v2  ;;  %v1522_v8 = vld [vmem:[#allocation8 + $0x90] sm:$0xf]  ;;  %v1414_v12 = vld [vmem:[#allocation6 + $0x78] sm:$0xf] }
  0x17   :  { %v1607_v9 = vld [vmem:[#allocation8 + $0x98] sm:$0xf0]  ;;  %283 = vmatpush.bf16.msra.mxu0 %v1439_v3  ;;  %v1427_v10 = vor.u32 %v1583_v6, %v1426_v5  ;;  %v1580_v13 = vld [vmem:[#allocation6 + $0x80] sm:$0xf0]  ;;  %v1510_v14 = vld [vmem:[#allocation8 + $0x78] sm:$0xf] }
  0x18   :  { %564 = vmatpush.bf16.msra.mxu3 %v1884_v7  ;;  %v1887_v11 = vor.u32 %v1607_v9, %v1522_v8  ;;  %v1604_v15 = vld [vmem:[#allocation8 + $0x80] sm:$0xf0]  ;;  %v1415_v16 = vor.u32 %v1580_v13, %v1414_v12  ;;  %v1402_v18 = vld [vmem:[#allocation6 + $0x60] sm:$0xf]  ;;  %v1577_v19 = vld [vmem:[#allocation6 + $0x68] sm:$0xf0] }
  0x19   :  { %v1890_v17 = vor.u32 %v1604_v15, %v1510_v14  ;;  %v1498_v20 = vld [vmem:[#allocation8 + $0x60] sm:$0xf]  ;;  %v1601_v21 = vld [vmem:[#allocation8 + $0x68] sm:$0xf0]  ;;  %v1403_v22 = vor.u32 %v1577_v19, %v1402_v18  ;;  %v1390_v23 = vld [vmem:[#allocation6 + $0x48] sm:$0xf] }
  0x1a   :  { %v1893_v24 = vor.u32 %v1601_v21, %v1498_v20  ;;  %v1574_v25 = vld [vmem:[#allocation6 + $0x50] sm:$0xf0]  ;;  %v1585_v26 = vld [vmem:[#allocation6 + $0xac] sm:$0xf]  ;;  %v1440_v27 = vld [vmem:[#allocation6 + $0xb4] sm:$0xf0] }
  0x1b   :  { %284 = vmatpush.bf16.msra.mxu0 %v1427_v10  ;;  %v1486_v28 = vld [vmem:[#allocation8 + $0x48] sm:$0xf]  ;;  %v1598_v29 = vld [vmem:[#allocation8 + $0x50] sm:$0xf0]  ;;  %v1443_v30 = vor.u32 %v1585_v26, %v1440_v27  ;;  %v1428_v32 = vld [vmem:[#allocation6 + $0x9c] sm:$0xf0]  ;;  %v1391_v33 = vor.u32 %v1574_v25, %v1390_v23 }
  0x1c   :  { %565 = vmatpush.bf16.msra.mxu3 %v1887_v11  ;;  %v1582_v31 = vld [vmem:[#allocation6 + $0x94] sm:$0xf]  ;;  %v1378_v34 = vld [vmem:[#allocation6 + $0x30] sm:$0xf]  ;;  %v1896_v36 = vor.u32 %v1598_v29, %v1486_v28  ;;  %v1571_v37 = vld [vmem:[#allocation6 + $0x38] sm:$0xf0] }
  0x1d   :  { %312 = vmatpush.bf16.msra.mxu1 %v1443_v30  ;;  %v1431_v35 = vor.u32 %v1582_v31, %v1428_v32  ;;  %v1579_v38 = vld [vmem:[#allocation6 + $0x7c] sm:$0xf]  ;;  %v1416_v39 = vld [vmem:[#allocation6 + $0x84] sm:$0xf0]  ;;  %v1474_v40 = vld [vmem:[#allocation8 + $0x30] sm:$0xf]  ;;  %v1379_v42 = vor.u32 %v1571_v37, %v1378_v34 }
  0x1e   :  { %v1595_v41 = vld [vmem:[#allocation8 + $0x38] sm:$0xf0]  ;;  %v1366_v43 = vld [vmem:[#allocation6 + $0x18] sm:$0xf]  ;;  %v1568_v44 = vld [vmem:[#allocation6 + $0x20] sm:$0xf0]  ;;  %v1419_v46 = vor.u32 %v1579_v38, %v1416_v39 }
  0x1f   :  { %285 = vmatpush.bf16.msra.mxu0 %v1415_v16  ;;  %v1462_v45 = vld [vmem:[#allocation8 + $0x18] sm:$0xf]  ;;  %v1899_v47 = vor.u32 %v1595_v41, %v1474_v40  ;;  %v1576_v48 = vld [vmem:[#allocation6 + $0x64] sm:$0xf]  ;;  %v1404_v49 = vld [vmem:[#allocation6 + $0x6c] sm:$0xf0]  ;;  %v1367_v54 = vor.u32 %v1568_v44, %v1366_v43 }
  0x20   :  { %566 = vmatpush.bf16.msra.mxu3 %v1890_v17  ;;  %v1592_v50 = vld [vmem:[#allocation8 + $0x20] sm:$0xf0]  ;;  %v1446_v51 = vld [vmem:[#allocation6 + $0xb0] sm:$0xf]  ;;  %v1587_v52 = vld [vmem:[#allocation6 + $0xb8] sm:$0xf0]  ;;  %v1407_v58 = vor.u32 %v1576_v48, %v1404_v49 }
  0x21   :  { %313 = vmatpush.bf16.msra.mxu1 %v1431_v35  ;;  %v1447_v53 = vor.u32 %v1587_v52, %v1446_v51  ;;  %v1354_v55 = vld [vmem:[#allocation6] sm:$0xf]  ;;  %v1565_v56 = vld [vmem:[#allocation6 + $0x8] sm:$0xf0]  ;;  %v1902_v59 = vor.u32 %v1592_v50, %v1462_v45  ;;  %v1392_v62 = vld [vmem:[#allocation6 + $0x54] sm:$0xf0] }
  0x22   :  { %v1450_v57 = vld [vmem:[#allocation8] sm:$0xf]  ;;  %v1589_v60 = vld [vmem:[#allocation8 + $0x8] sm:$0xf0]  ;;  %v1542_v63 = vld [vmem:[#allocation8 + $0xb0] sm:$0xf]  ;;  %v1355_v5 = vor.u32 %v1565_v56, %v1354_v55 }
  0x23   :  { %286 = vmatpush.bf16.msra.mxu0 %v1403_v22  ;;  %v1573_v61 = vld [vmem:[#allocation6 + $0x4c] sm:$0xf]  ;;  %341 = vmatpush.bf16.msra.mxu2 %v1447_v53  ;;  %v1611_v0 = vld [vmem:[#allocation8 + $0xb8] sm:$0xf0]  ;;  %v1434_v1 = vld [vmem:[#allocation6 + $0x98] sm:$0xf]  ;;  %v1905_v9 = vor.u32 %v1589_v60, %v1450_v57 }
  0x24   :  { %567 = vmatpush.bf16.msra.mxu3 %v1893_v24  ;;  %v1609_v2 = vld [vmem:[#allocation8 + $0xac] sm:$0xf]  ;;  %v1536_v3 = vld [vmem:[#allocation8 + $0xb4] sm:$0xf0]  ;;  %v1584_v4 = vld [vmem:[#allocation6 + $0xa0] sm:$0xf0]  ;;  %v1395_v6 = vor.u32 %v1573_v61, %v1392_v62  ;;  %v1907_v10 = vor.u32 %v1611_v0, %v1542_v63 }
  0x25   :  { %314 = vmatpush.bf16.msra.mxu1 %v1419_v46  ;;  %v1435_v8 = vor.u32 %v1584_v4, %v1434_v1  ;;  %v1530_v12 = vld [vmem:[#allocation8 + $0x98] sm:$0xf]  ;;  %v1570_v13 = vld [vmem:[#allocation6 + $0x34] sm:$0xf]  ;;  %v1380_v14 = vld [vmem:[#allocation6 + $0x3c] sm:$0xf0]  ;;  %v1909_v15 = vor.u32 %v1609_v2, %v1536_v3 }
  0x26   :  { %v1608_v16 = vld [vmem:[#allocation8 + $0xa0] sm:$0xf0]  ;;  %v1422_v18 = vld [vmem:[#allocation6 + $0x80] sm:$0xf]  ;;  %v1581_v19 = vld [vmem:[#allocation6 + $0x88] sm:$0xf0]  ;;  %v1383_v25 = vor.u32 %v1570_v13, %v1380_v14 }
  0x27   :  { %287 = vmatpush.bf16.msra.mxu0 %v1391_v33  ;;  %342 = vmatpush.bf16.msra.mxu2 %v1435_v8  ;;  %v1911_v20 = vld [vmem:[#allocation3] sm:$0xff]  ;;  %v1606_v21 = vld [vmem:[#allocation8 + $0x94] sm:$0xf]  ;;  %v1423_v23 = vor.u32 %v1581_v19, %v1422_v18  ;;  %v1915_v26 = vor.u32 %v1608_v16, %v1530_v12  ;;  %v1567_v28 = vld [vmem:[#allocation6 + $0x1c] sm:$0xf]  ;;  %v1840_v39 = vmov 0  }
  0x28   :  { %568 = vmatpush.bf16.msra.mxu3 %v1896_v36  ;;  %v1524_v22 = vld [vmem:[#allocation8 + $0x9c] sm:$0xf0]  ;;  %v1368_v29 = vld [vmem:[#allocation6 + $0x24] sm:$0xf0]  ;;  %v1605_v31 = vld [vmem:[#allocation8 + $0x88] sm:$0xf0] }
  0x29   :  { %315 = vmatpush.bf16.msra.mxu1 %v1407_v58  ;;  %v1518_v27 = vld [vmem:[#allocation8 + $0x80] sm:$0xf]  ;;  %v1918_v30 = vor.u32 %v1606_v21, %v1524_v22  ;;  %v1410_v32 = vld [vmem:[#allocation6 + $0x68] sm:$0xf]  ;;  %v1578_v33 = vld [vmem:[#allocation6 + $0x70] sm:$0xf0]  ;;  %v1371_v40 = vor.u32 %v1567_v28, %v1368_v29 }
  0x2a   :  { %v1603_v34 = vld [vmem:[#allocation8 + $0x7c] sm:$0xf]  ;;  %v1512_v35 = vld [vmem:[#allocation8 + $0x84] sm:$0xf0]  ;;  %v1411_v37 = vor.u32 %v1578_v33, %v1410_v32  ;;  %v1398_v38 = vld [vmem:[#allocation6 + $0x50] sm:$0xf] }
  0x2b   :  { %288 = vmatpush.bf16.msra.mxu0 %v1379_v42  ;;  %343 = vmatpush.bf16.msra.mxu2 %v1423_v23  ;;  %v1575_v41 = vld [vmem:[#allocation6 + $0x58] sm:$0xf0]  ;;  %v1923_v42 = vor.u32 %v1605_v31, %v1518_v27  ;;  %v1564_v43 = vld [vmem:[#allocation6 + $0x4] sm:$0xf]  ;;  %v1356_v44 = vld [vmem:[#allocation6 + $0xc] sm:$0xf0]  ;;  %v1926_v45 = vor.u32 %v1603_v34, %v1512_v35 }
  0x2c   :  { %569 = vmatpush.bf16.msra.mxu3 %v1899_v47  ;;  %v1600_v46 = vld [vmem:[#allocation8 + $0x64] sm:$0xf]  ;;  %v1506_v48 = vld [vmem:[#allocation8 + $0x68] sm:$0xf]  ;;  %v1602_v49 = vld [vmem:[#allocation8 + $0x70] sm:$0xf0]  ;;  %v1399_v50 = vor.u32 %v1575_v41, %v1398_v38 }
  0x2d   :  { %316 = vmatpush.bf16.msra.mxu1 %v1395_v6  ;;  %v1500_v51 = vld [vmem:[#allocation8 + $0x6c] sm:$0xf0]  ;;  %v1386_v52 = vld [vmem:[#allocation6 + $0x38] sm:$0xf]  ;;  %v1572_v53 = vld [vmem:[#allocation6 + $0x40] sm:$0xf0]  ;;  %v1929_v55 = vor.u32 %v1602_v49, %v1506_v48 }
  0x2e   :  { %v1932_v56 = vor.u32 %v1600_v46, %v1500_v51  ;;  %v1597_v57 = vld [vmem:[#allocation8 + $0x4c] sm:$0xf]  ;;  %v1494_v58 = vld [vmem:[#allocation8 + $0x50] sm:$0xf]  ;;  %v1599_v60 = vld [vmem:[#allocation8 + $0x58] sm:$0xf0]  ;;  %v1387_v61 = vor.u32 %v1572_v53, %v1386_v52 }
  0x2f   :  { %289 = vmatpush.bf16.msra.mxu0 %v1367_v54  ;;  %344 = vmatpush.bf16.msra.mxu2 %v1411_v37  ;;  %v1359_v54 = vor.u32 %v1564_v43, %v1356_v44  ;;  %v1488_v62 = vld [vmem:[#allocation8 + $0x54] sm:$0xf0]  ;;  %v1374_v63 = vld [vmem:[#allocation6 + $0x20] sm:$0xf]  ;;  %v1569_v0 = vld [vmem:[#allocation6 + $0x28] sm:$0xf0]  ;;  %v1935_v1 = vor.u32 %v1599_v60, %v1494_v58 }
  0x30   :  { %570 = vmatpush.bf16.msra.mxu3 %v1902_v59  ;;  %v1939_v2 = vor.u32 %v1597_v57, %v1488_v62  ;;  %v1482_v3 = vld [vmem:[#allocation8 + $0x38] sm:$0xf]  ;;  %v1596_v4 = vld [vmem:[#allocation8 + $0x40] sm:$0xf0]  ;;  %v1561_v6 = vld [vmem:[#allocation3 + $0x8] sm:$0xff]  ;;  %s1317_s20 = sshll.u32 %s2262_s5, 4  ;;  %s1318_s20 = int_to_ptr.hbm [resolvable:$true] %s1317_s20 }
  0x31   :  { %317 = vmatpush.bf16.msra.mxu1 %v1383_v25  ;;  %v1594_v8 = vld [vmem:[#allocation8 + $0x34] sm:$0xf]  ;;  %v1476_v12 = vld [vmem:[#allocation8 + $0x3c] sm:$0xf0]  ;;  %v1943_v13 = vor.u32 %v1596_v4, %v1482_v3  ;;  %v1591_v16 = vld [vmem:[#allocation8 + $0x1c] sm:$0xf] }
  0x32   :  { %v1947_v14 = vor.u32 %v1594_v8, %v1476_v12  ;;  %v1362_v18 = vld [vmem:[#allocation6 + $0x8] sm:$0xf]  ;;  %v1566_v19 = vld [vmem:[#allocation6 + $0x10] sm:$0xf0]  ;;  %v1470_v22 = vld [vmem:[#allocation8 + $0x20] sm:$0xf] }
  0x33   :  { %290 = vmatpush.bf16.msra.mxu0 %v1355_v5  ;;  %345 = vmatpush.bf16.msra.mxu2 %v1399_v50  ;;  %v1375_v5 = vor.u32 %v1569_v0, %v1374_v63  ;;  %v1464_v21 = vld [vmem:[#allocation8 + $0x24] sm:$0xf0]  ;;  %v1593_v23 = vld [vmem:[#allocation8 + $0x28] sm:$0xf0]  ;;  %v1363_v25 = vor.u32 %v1566_v19, %v1362_v18  ;;  %v1590_v31 = vld [vmem:[#allocation8 + $0x10] sm:$0xf0] }
  0x34   :  { %571 = vmatpush.bf16.msra.mxu3 %v1905_v9  ;;  %v1950_v27 = vor.u32 %v1593_v23, %v1470_v22  ;;  %v1954_v28 = vor.u32 %v1591_v16, %v1464_v21  ;;  %v1458_v29 = vld [vmem:[#allocation8 + $0x8] sm:$0xf]  ;;  %v1588_v32 = vld [vmem:[#allocation8 + $0x4] sm:$0xf]  ;;  %v1452_v33 = vld [vmem:[#allocation8 + $0xc] sm:$0xf0] }
  0x35   :  { %318 = vmatpush.bf16.msra.mxu1 %v1371_v40  ;;  %v1959_v34 = vor.u32 %v1590_v31, %v1458_v29  ;;  %v1962_v35 = vor.u32 %v1588_v32, %v1452_v33  ;;  %v1562_v37 = vld [vmem:[#allocation3 + $0x10] sm:$0xff] }
  0x36   :  { %291 = vmatmul.bf16.vlgmr.msra.gmra.mxu0 %v1911_v20 }
  0x37   :  { %590 = vmatpush.bf16.msrb.mxu0 %v1907_v10  ;;  %572 = vmatmul.bf16.vlgmr.msra.gmra.mxu3 %v1840_v39 }
  0x38   :  { %577 = vmatpush.bf16.msrb.mxu3 %v1909_v15  ;;  %346 = vmatpush.bf16.msra.mxu2 %v1387_v61 }
  0x39   :  { %319 = vmatpush.bf16.msra.mxu1 %v1359_v54 }
  0x3b   :  { %591 = vmatpush.bf16.msrb.mxu0 %v1915_v26 }
  0x3c   :  { %578 = vmatpush.bf16.msrb.mxu3 %v1918_v30  ;;  %320 = vmatmul.bf16.vlgmr.msra.gmra.mxu1 %v1911_v20 }
  0x3d   :  { %658 = vmatpush.bf16.msrb.mxu1 %v1884_v7  ;;  %347 = vmatpush.bf16.msra.mxu2 %v1375_v5 }
  0x3f   :  { %592 = vmatpush.bf16.msrb.mxu0 %v1923_v42 }
  0x40   :  { %579 = vmatpush.bf16.msrb.mxu3 %v1926_v45 }
  0x41   :  { %659 = vmatpush.bf16.msrb.mxu1 %v1887_v11  ;;  %348 = vmatpush.bf16.msra.mxu2 %v1363_v25 }
  0x43   :  { %593 = vmatpush.bf16.msrb.mxu0 %v1929_v55 }
  0x44   :  { %580 = vmatpush.bf16.msrb.mxu3 %v1932_v56  ;;  %349 = vmatmul.bf16.vlgmr.msra.gmra.mxu2 %v1911_v20  ;;  %v1563_v20 = vld [vmem:[#allocation3 + $0x18] sm:$0xff] }
  0x45   :  { %660 = vmatpush.bf16.msrb.mxu1 %v1890_v17  ;;  %671 = vmatpush.bf16.msrb.mxu2 %v1909_v15 }
  0x46   :  { %296 = vmatmul.bf16.gmra.mxu0 %v1561_v6 }
  0x47   :  { %594 = vmatpush.bf16.msrb.mxu0 %v1935_v1 }
  0x48   :  { %581 = vmatpush.bf16.msrb.mxu3 %v1939_v2 }
  0x49   :  { %661 = vmatpush.bf16.msrb.mxu1 %v1893_v24  ;;  %672 = vmatpush.bf16.msrb.mxu2 %v1918_v30 }
  0x4b   :  { %595 = vmatpush.bf16.msrb.mxu0 %v1943_v13 }
  0x4c   :  { %582 = vmatpush.bf16.msrb.mxu3 %v1947_v14  ;;  %325 = vmatmul.bf16.gmra.mxu1 %v1561_v6 }
  0x4d   :  { %662 = vmatpush.bf16.msrb.mxu1 %v1896_v36  ;;  %673 = vmatpush.bf16.msrb.mxu2 %v1926_v45 }
  0x4f   :  { %596 = vmatpush.bf16.msrb.mxu0 %v1950_v27 }
  0x50   :  { %583 = vmatpush.bf16.msrb.mxu3 %v1954_v28 }
  0x51   :  { %663 = vmatpush.bf16.msrb.mxu1 %v1899_v47  ;;  %674 = vmatpush.bf16.msrb.mxu2 %v1932_v56 }
  0x53   :  { %597 = vmatpush.bf16.msrb.mxu0 %v1959_v34 }
  0x54   :  { %584 = vmatpush.bf16.msrb.mxu3 %v1962_v35  ;;  %354 = vmatmul.bf16.gmra.mxu2 %v1561_v6 }
  0x55   :  { %664 = vmatpush.bf16.msrb.mxu1 %v1902_v59  ;;  %675 = vmatpush.bf16.msrb.mxu2 %v1939_v2 }
  0x56   :  { %301 = vmatmul.bf16.gmra.mxu0 %v1562_v37 }
  0x57   :  { %752 = vmatpush.bf16.msra.mxu0 %v1884_v7  ;;  %585 = vmatmul.bf16.vlgmr.msrb.gmra.mxu3 %v1840_v39 }
  0x58   :  { %684 = vmatpush.bf16.msra.mxu3 %v1907_v10 }
  0x59   :  { %665 = vmatpush.bf16.msrb.mxu1 %v1905_v9  ;;  %676 = vmatpush.bf16.msrb.mxu2 %v1947_v14 }
  0x5b   :  { %753 = vmatpush.bf16.msra.mxu0 %v1887_v11 }
  0x5c   :  { %685 = vmatpush.bf16.msra.mxu3 %v1915_v26  ;;  %330 = vmatmul.bf16.gmra.mxu1 %v1562_v37 }
  0x5d   :  { %765 = vmatpush.bf16.msra.mxu1 %v1909_v15  ;;  %677 = vmatpush.bf16.msrb.mxu2 %v1954_v28 }
  0x5f   :  { %754 = vmatpush.bf16.msra.mxu0 %v1890_v17 }
  0x60   :  { %686 = vmatpush.bf16.msra.mxu3 %v1923_v42 }
  0x61   :  { %766 = vmatpush.bf16.msra.mxu1 %v1918_v30  ;;  %678 = vmatpush.bf16.msrb.mxu2 %v1962_v35 }
  0x63   :  { %755 = vmatpush.bf16.msra.mxu0 %v1893_v24 }
  0x64   :  { %687 = vmatpush.bf16.msra.mxu3 %v1929_v55  ;;  %359 = vmatmul.bf16.gmra.mxu2 %v1562_v37 }
  0x65   :  { %778 = vmatpush.bf16.msra.mxu2 %v1907_v10  ;;  %767 = vmatpush.bf16.msra.mxu1 %v1926_v45 }
  0x66   :  { %306 = vmatmul.bf16.gmra.mxu0 %v1563_v20 }
  0x67   :  { %756 = vmatpush.bf16.msra.mxu0 %v1896_v36 }
  0x68   :  { %688 = vmatpush.bf16.msra.mxu3 %v1935_v1 }
  0x69   :  { %779 = vmatpush.bf16.msra.mxu2 %v1915_v26  ;;  %768 = vmatpush.bf16.msra.mxu1 %v1932_v56 }
  0x6b   :  { %757 = vmatpush.bf16.msra.mxu0 %v1899_v47 }
  0x6c   :  { %689 = vmatpush.bf16.msra.mxu3 %v1943_v13  ;;  %335 = vmatmul.bf16.gmra.mxu1 %v1563_v20 }
  0x6d   :  { %780 = vmatpush.bf16.msra.mxu2 %v1923_v42  ;;  %769 = vmatpush.bf16.msra.mxu1 %v1939_v2 }
  0x6f   :  { %758 = vmatpush.bf16.msra.mxu0 %v1902_v59 }
  0x70   :  { %690 = vmatpush.bf16.msra.mxu3 %v1950_v27 }
  0x71   :  { %781 = vmatpush.bf16.msra.mxu2 %v1929_v55  ;;  %770 = vmatpush.bf16.msra.mxu1 %v1947_v14 }
  0x73   :  { %759 = vmatpush.bf16.msra.mxu0 %v1905_v9 }
  0x74   :  { %691 = vmatpush.bf16.msra.mxu3 %v1959_v34  ;;  %364 = vmatmul.bf16.gmra.mxu2 %v1563_v20 }
  0x75   :  { %782 = vmatpush.bf16.msra.mxu2 %v1935_v1  ;;  %771 = vmatpush.bf16.msra.mxu1 %v1954_v28 }
  0x76   :  { %598 = vmatmul.bf16.vlgmr.msrb.gmra.mxu0 %v1840_v39  ;;  %v123_v39 = vld [vmem:[#allocation9] sm:$0x7] }
  0x77   :  { %859 = vmatpush.bf16.msrb.mxu0 %v1909_v15  ;;  %v125_v40 = vperm.slane %v123_v39, 0  ;;  %v2034_v57 = vperm.slane %v123_v39, 1 }
  0x78   :  { %846 = vmatpush.bf16.msrb.mxu3 %v1884_v7 }
  0x79   :  { %783 = vmatpush.bf16.msra.mxu2 %v1943_v13  ;;  %772 = vmatpush.bf16.msra.mxu1 %v1962_v35 }
  0x7b   :  { %860 = vmatpush.bf16.msrb.mxu0 %v1918_v30 }
  0x7c   :  { %847 = vmatpush.bf16.msrb.mxu3 %v1887_v11 }
  0x7d   :  { %784 = vmatpush.bf16.msra.mxu2 %v1950_v27 }
  0x7f   :  { %861 = vmatpush.bf16.msrb.mxu0 %v1926_v45 }
  0x80   :  { %848 = vmatpush.bf16.msrb.mxu3 %v1890_v17 }
  0x81   :  { %785 = vmatpush.bf16.msra.mxu2 %v1959_v34 }
  0x83   :  { %862 = vmatpush.bf16.msrb.mxu0 %v1932_v56 }
  0x84   :  { %849 = vmatpush.bf16.msrb.mxu3 %v1893_v24 }
  0x87   :  { %863 = vmatpush.bf16.msrb.mxu0 %v1939_v2 }
  0x88   :  { %850 = vmatpush.bf16.msrb.mxu3 %v1896_v36 }
  0x8b   :  { %864 = vmatpush.bf16.msrb.mxu0 %v1947_v14 }
  0x8c   :  { %851 = vmatpush.bf16.msrb.mxu3 %v1899_v47 }
  0x8f   :  { %865 = vmatpush.bf16.msrb.mxu0 %v1954_v28 }
  0x90   :  { %852 = vmatpush.bf16.msrb.mxu3 %v1902_v59 }
  0x93   :  { %866 = vmatpush.bf16.msrb.mxu0 %v1962_v35 }
  0x94   :  { %853 = vmatpush.bf16.msrb.mxu3 %v1905_v9 }
  0xb3   :  { %v292_v38 = vpop.f32.mrf.mxu0 }
  0xb4   :  { %v293_v46 = vadd.f32 %v292_v38, %v125_v40 }
  0xb9   :  { %v321_v58 = vpop.f32.mrf.mxu1 }
  0xba   :  { %v573_v41 = vpop.f32.mrf.mxu3  ;;  %v322_v63 = vadd.f32 %v321_v58, %v2034_v57 }
  0xbb   :  { %v294_v43 = vpop.f32.mrf.mxu0  ;;  %v603_v50 = vadd.f32 %v573_v41, %v293_v46  ;;  %v2050_v46 = vld [vmem:[%s2261_s4] ss:$0 sm:$0xff] }
  0xbc   :  { %v2028_v44 = vadd.f32 %v294_v43, %v125_v40  ;;  %v2045_v43 = vperm.slane %v123_v39, 2 }
  0xbd   :  { %v1544_v52 = vmul.f32 -1.442695, %v603_v50 }
  0xbf   :  { %1623 = vpow2.f32 %v1544_v52 }
  0xc2   :  { %v575_v48 = vpop.f32.mrf.mxu3 }
  0xc3   :  { %v297_v49 = vpop.f32.mrf.mxu0 }
  0xc4   :  { %v2030_v51 = vadd.f32 %v297_v49, %v125_v40 }
  0xc5   :  { %v1624_v60 = vpop.eup %1623 }
  0xc6   :  { %v607_v0 = vadd.f32 1.0, %v1624_v60 }
  0xc7   :  { %v350_v52 = vpop.f32.mrf.mxu2 }
  0xc8   :  { %1625 = vrcp.f32 %v607_v0  ;;  %v619_v41 = vand.u32 2147483648, %v607_v0  ;;  %vm613_vm1 = vweird.f32 %v607_v0  ;;  %v617_v48 = vand.u32 2147483647, %v607_v0 }
  0xc9   :  { %v351_v58 = vadd.f32 %v350_v52, %v2045_v43 }
  0xca   :  { %vm618_vm3 = vcmp.eq.f32.partialorder %v617_v48, 8.507059e+37 }
  0xcb   :  { %v299_v53 = vpop.f32.mrf.mxu0 }
  0xcc   :  { %v2032_v54 = vadd.f32 %v299_v53, %v125_v40 }
  0xce   :  { %v1626_v12 = vpop.eup %1625 }
  0xcf   :  { %v609_v19 = vmul.f32 %v1626_v12, %v607_v0  ;;  %vm614_vm0 = vweird.f32 %v1626_v12 }
  0xd0   :  { %vm615_vm2 = vmor %vm613_vm1, %vm614_vm0 }
  0xd1   :  { %v610_v25 = vsub.f32 1.0, %v609_v19 }
  0xd3   :  { %v302_v61 = vpop.f32.mrf.mxu0  ;;  %v611_v29 = vmul.f32 %v1626_v12, %v610_v25 }
  0xd4   :  { %v2036_v62 = vadd.f32 %v302_v61, %v125_v40 }
  0xd5   :  { %v612_v38 = vadd.f32 %v1626_v12, %v611_v29 }
  0xd7   :  { %v616_v50 = vsel %vm615_vm2, %v1626_v12, %v612_v38 }
  0xda   :  { %v586_v3 = vpop.f32.mrf.mxu3 }
  0xdb   :  { %v623_v4 = vadd.f32 %v586_v3, %v322_v63  ;;  %v304_v6 = vpop.f32.mrf.mxu0 }
  0xdc   :  { %v2039_v8 = vadd.f32 %v304_v6, %v125_v40 }
  0xdd   :  { %v1545_v5 = vmul.f32 -1.442695, %v623_v4 }
  0xdf   :  { %1627 = vpow2.f32 %v1545_v5 }
  0xe2   :  { %v588_v16 = vpop.f32.mrf.mxu3 }
  0xe3   :  { %v307_v22 = vpop.f32.mrf.mxu0 }
  0xe4   :  { %v2041_v23 = vadd.f32 %v307_v22, %v125_v40 }
  0xe5   :  { %v1628_v18 = vpop.eup %1627 }
  0xe6   :  { %v627_v21 = vadd.f32 1.0, %v1628_v18  ;;  %2263 = vst [vmem:[#allocation16_spill] sm:$0xff] %v2041_v23 }
  0xe8   :  { %1629 = vrcp.f32 %v627_v21  ;;  %vm633_vm4 = vweird.f32 %v627_v21  ;;  %v639_v3 = vand.u32 2147483648, %v627_v21  ;;  %v637_v4 = vand.u32 2147483647, %v627_v21 }
  0xea   :  { %v640_v6 = vor.u32 1.1754944e-38, %v639_v3  ;;  %vm638_vm7 = vcmp.eq.f32.partialorder %v637_v4, 8.507059e+37 }
  0xeb   :  { %v309_v32 = vpop.f32.mrf.mxu0 }
  0xec   :  { %v2043_v37 = vadd.f32 %v309_v32, %v125_v40  ;;  %v620_v40 = vor.u32 1.1754944e-38, %v619_v41 }
  0xee   :  { %v1630_v31 = vpop.eup %1629  ;;  %2264 = vst [vmem:[#allocation17_spill] sm:$0xff] %v2043_v37  ;;  %v621_v39 = vsel %vm618_vm3, %v620_v40, %v616_v50 }
  0xef   :  { %v629_v33 = vmul.f32 %v1630_v31, %v627_v21  ;;  %vm634_vm5 = vweird.f32 %v1630_v31  ;;  %v323_v21 = vpop.f32.mrf.mxu1 }
  0xf0   :  { %vm635_vm6 = vmor %vm633_vm4, %vm634_vm5  ;;  %v324_v3 = vadd.f32 %v323_v21, %v2034_v57 }
  0xf1   :  { %v630_v20 = vsub.f32 1.0, %v629_v33 }
  0xf3   :  { %v631_v49 = vmul.f32 %v1630_v31, %v630_v20  ;;  %v599_v53 = vpop.f32.mrf.mxu0 }
  0xf4   :  { %v643_v60 = vadd.f32 %v2050_v46, %v599_v53 }
  0xf5   :  { %v632_v61 = vadd.f32 %v1630_v31, %v631_v49 }
  0xf6   :  { %v644_v63 = vmul.f32 %v643_v60, %v621_v39 }
  0xf7   :  { %v636_v0 = vsel %vm635_vm6, %v1630_v31, %v632_v61  ;;  %v352_v31 = vpop.f32.mrf.mxu2  ;;  %v2082_v33 = vpop.f32.mrf.mxu1 }
  0xf8   :  { %v645_v5 = vadd.f32 %v644_v63, %v351_v58  ;;  %v641_v16 = vsel %vm638_vm7, %v640_v6, %v636_v0 }
  0xf9   :  { %v647_v18 = vsub.f32 1.0, %v641_v16  ;;  %v649_v25 = vmul.f32 0.0, %v641_v16 }
  0xfa   :  { %1631 = vtanh.f32 %v645_v5 }
  0xfb   :  { %v601_v12 = vpop.f32.mrf.mxu0 }
  0xff   :  { %v2084_v20 = vpop.f32.mrf.mxu2  ;;  %v2086_v38 = vpop.f32.mrf.mxu1 }
 0x100   :  { %v1632_v19 = vpop.eup %1631 }
 0x101   :  { %v648_v22 = vmul.f32 %v1632_v19, %v647_v18 }
 0x103   :  { %v2054_v29 = vadd.f32 %v649_v25, %v648_v22 }
 0x105   :  { %v657_v32 = vpack.c.bf16 %v2054_v29, %v2054_v29 }
 0x107   :  { %666 = vmatmul.bf16.vlgmr.msrb.gmra.mxu1 %v657_v32  ;;  %679 = vmatmul.bf16.vlgmr.msrb.gmra.mxu2 %v657_v32  ;;  %v2088_v41 = vpop.f32.mrf.mxu2  ;;  %v2090_v48 = vpop.f32.mrf.mxu1 }
 0x108   :  { %692 = vmatmul.bf16.vlgmr.msra.gmra.mxu3 %v657_v32  ;;  %872 = vmatpush.bf16.msrb.mxu1 %v1907_v10 }
 0x109   :  { %940 = vmatpush.bf16.msrb.mxu2 %v1884_v7  ;;  %953 = vmatpush.bf16.msra.mxu3 %v1909_v15 }
 0x10c   :  { %873 = vmatpush.bf16.msrb.mxu1 %v1915_v26 }
 0x10d   :  { %941 = vmatpush.bf16.msrb.mxu2 %v1887_v11  ;;  %954 = vmatpush.bf16.msra.mxu3 %v1918_v30 }
 0x10f   :  { %v2092_v49 = vpop.f32.mrf.mxu2  ;;  %v2094_v50 = vpop.f32.mrf.mxu1 }
 0x110   :  { %874 = vmatpush.bf16.msrb.mxu1 %v1923_v42 }
 0x111   :  { %942 = vmatpush.bf16.msrb.mxu2 %v1890_v17  ;;  %955 = vmatpush.bf16.msra.mxu3 %v1926_v45 }
 0x114   :  { %875 = vmatpush.bf16.msrb.mxu1 %v1929_v55 }
 0x115   :  { %943 = vmatpush.bf16.msrb.mxu2 %v1893_v24  ;;  %956 = vmatpush.bf16.msra.mxu3 %v1932_v56 }
 0x117   :  { %v2096_v52 = vpop.f32.mrf.mxu2  ;;  %v2098_v53 = vpop.f32.mrf.mxu1 }
 0x118   :  { %876 = vmatpush.bf16.msrb.mxu1 %v1935_v1 }
 0x119   :  { %944 = vmatpush.bf16.msrb.mxu2 %v1896_v36  ;;  %957 = vmatpush.bf16.msra.mxu3 %v1939_v2 }
 0x11c   :  { %877 = vmatpush.bf16.msrb.mxu1 %v1943_v13 }
 0x11d   :  { %945 = vmatpush.bf16.msrb.mxu2 %v1899_v47  ;;  %958 = vmatpush.bf16.msra.mxu3 %v1947_v14 }
 0x11f   :  { %v2100_v40 = vpop.f32.mrf.mxu2  ;;  %v2102_v58 = vpop.f32.mrf.mxu1 }
 0x120   :  { %878 = vmatpush.bf16.msrb.mxu1 %v1950_v27  ;;  %2265 = vst [vmem:[#allocation18_spill] sm:$0xff] %v2100_v40 }
 0x121   :  { %946 = vmatpush.bf16.msrb.mxu2 %v1902_v59  ;;  %959 = vmatpush.bf16.msra.mxu3 %v1954_v28  ;;  %2266 = vst [vmem:[#allocation19_spill] sm:$0xff] %v2102_v58 }
 0x124   :  { %879 = vmatpush.bf16.msrb.mxu1 %v1959_v34 }
 0x125   :  { %947 = vmatpush.bf16.msrb.mxu2 %v1905_v9  ;;  %960 = vmatpush.bf16.msra.mxu3 %v1962_v35 }
 0x127   :  { %v2104_v60 = vpop.f32.mrf.mxu2 }
 0x128   :  { %2267 = vst [vmem:[#allocation20_spill] sm:$0xff] %v2104_v60 }
 0x184   :  { %v667_v39 = vpop.f32.mrf.mxu1 }
 0x185   :  { %v697_v61 = vadd.f32 %v667_v39, %v2028_v44 }
 0x187   :  { %v1546_v63 = vmul.f32 -1.442695, %v697_v61 }
 0x189   :  { %1633 = vpow2.f32 %v1546_v63 }
 0x18a   :  { %v680_v4 = vpop.f32.mrf.mxu2 }
 0x18b   :  { %v717_v5 = vadd.f32 %v680_v4, %v324_v3  ;;  %v693_v0 = vpop.f32.mrf.mxu3 }
 0x18c   :  { %v669_v6 = vpop.f32.mrf.mxu1 }
 0x18d   :  { %v1547_v12 = vmul.f32 -1.442695, %v717_v5 }
 0x18f   :  { %v1634_v16 = vpop.eup %1633  ;;  %1635 = vpow2.f32 %v1547_v12 }
 0x190   :  { %v701_v18 = vadd.f32 1.0, %v1634_v16 }
 0x192   :  { %1637 = vrcp.f32 %v701_v18  ;;  %v682_v19 = vpop.f32.mrf.mxu2  ;;  %v713_v61 = vand.u32 2147483648, %v701_v18  ;;  %v711_v63 = vand.u32 2147483647, %v701_v18  ;;  %vm707_vm9 = vweird.f32 %v701_v18 }
 0x193   :  { %v695_v22 = vpop.f32.mrf.mxu3  ;;  %v737_v19 = vadd.f32 %v2050_v46, %v693_v0 }
 0x194   :  { %v714_v5 = vor.u32 1.1754944e-38, %v713_v61  ;;  %vm712_vm11 = vcmp.eq.f32.partialorder %v711_v63, 8.507059e+37  ;;  %v353_v22 = vadd.f32 %v352_v31, %v2045_v43 }
 0x195   :  { %v1636_v25 = vpop.eup %1635 }
 0x196   :  { %v721_v32 = vadd.f32 1.0, %v1636_v25 }
 0x198   :  { %v1638_v60 = vpop.eup %1637  ;;  %1639 = vrcp.f32 %v721_v32  ;;  %v731_v58 = vand.u32 2147483647, %v721_v32  ;;  %vm727_vm13 = vweird.f32 %v721_v32 }
 0x199   :  { %v703_v44 = vmul.f32 %v1638_v60, %v701_v18  ;;  %vm708_vm8 = vweird.f32 %v1638_v60 }
 0x19a   :  { %vm709_vm10 = vmor %vm707_vm9, %vm708_vm8  ;;  %vm732_vm15 = vcmp.eq.f32.partialorder %v731_v58, 8.507059e+37 }
 0x19b   :  { %v704_v39 = vsub.f32 1.0, %v703_v44  ;;  %v733_v44 = vand.u32 2147483648, %v721_v32 }
 0x19d   :  { %v705_v21 = vmul.f32 %v1638_v60, %v704_v39  ;;  %v734_v18 = vor.u32 1.1754944e-38, %v733_v44 }
 0x19e   :  { %v1640_v3 = vpop.eup %1639 }
 0x19f   :  { %v723_v4 = vmul.f32 %v1640_v3, %v721_v32  ;;  %v706_v6 = vadd.f32 %v1638_v60, %v705_v21  ;;  %vm728_vm12 = vweird.f32 %v1640_v3 }
 0x1a0   :  { %vm729_vm14 = vmor %vm727_vm13, %vm728_vm12 }
 0x1a1   :  { %v724_v12 = vsub.f32 1.0, %v723_v4  ;;  %v710_v16 = vsel %vm709_vm10, %v1638_v60, %v706_v6 }
 0x1a2   :  { %v715_v25 = vsel %vm712_vm11, %v714_v5, %v710_v16 }
 0x1a3   :  { %v725_v37 = vmul.f32 %v1640_v3, %v724_v12  ;;  %v738_v39 = vmul.f32 %v737_v19, %v715_v25 }
 0x1a5   :  { %v739_v40 = vadd.f32 %v738_v39, %v353_v22  ;;  %v726_v23 = vadd.f32 %v1640_v3, %v725_v37 }
 0x1a7   :  { %1641 = vtanh.f32 %v739_v40  ;;  %v730_v61 = vsel %vm729_vm14, %v1640_v3, %v726_v23  ;;  %v327_v23 = vadd.f32 %v2082_v33, %v2034_v57 }
 0x1a8   :  { %v735_v60 = vsel %vm732_vm15, %v734_v18, %v730_v61 }
 0x1a9   :  { %v741_v21 = vsub.f32 1.0, %v735_v60  ;;  %v743_v31 = vmul.f32 %v735_v60, %v2054_v29 }
 0x1ad   :  { %v1642_v63 = vpop.eup %1641 }
 0x1ae   :  { %v742_v0 = vmul.f32 %v1642_v63, %v741_v21 }
 0x1b0   :  { %v2111_v4 = vadd.f32 %v743_v31, %v742_v0 }
 0x1b2   :  { %v751_v6 = vpack.c.bf16 %v2111_v4, %v2111_v4 }
 0x1b4   :  { %760 = vmatmul.bf16.vlgmr.msra.gmra.mxu0 %v751_v6  ;;  %773 = vmatmul.bf16.vlgmr.msra.gmra.mxu1 %v751_v6 }
 0x1b5   :  { %786 = vmatmul.bf16.vlgmr.msra.gmra.mxu2 %v751_v6  ;;  %966 = vmatpush.bf16.msra.mxu0 %v1907_v10 }
 0x1b6   :  { %1034 = vmatpush.bf16.msra.mxu1 %v1884_v7  ;;  %1047 = vmatpush.bf16.msra.mxu2 %v1909_v15 }
 0x1b9   :  { %967 = vmatpush.bf16.msra.mxu0 %v1915_v26 }
 0x1ba   :  { %1035 = vmatpush.bf16.msra.mxu1 %v1887_v11  ;;  %1048 = vmatpush.bf16.msra.mxu2 %v1918_v30 }
 0x1bd   :  { %968 = vmatpush.bf16.msra.mxu0 %v1923_v42 }
 0x1be   :  { %1036 = vmatpush.bf16.msra.mxu1 %v1890_v17  ;;  %1049 = vmatpush.bf16.msra.mxu2 %v1926_v45 }
 0x1c1   :  { %969 = vmatpush.bf16.msra.mxu0 %v1929_v55 }
 0x1c2   :  { %1037 = vmatpush.bf16.msra.mxu1 %v1893_v24  ;;  %1050 = vmatpush.bf16.msra.mxu2 %v1932_v56 }
 0x1c5   :  { %970 = vmatpush.bf16.msra.mxu0 %v1935_v1 }
 0x1c6   :  { %1038 = vmatpush.bf16.msra.mxu1 %v1896_v36  ;;  %1051 = vmatpush.bf16.msra.mxu2 %v1939_v2 }
 0x1c9   :  { %971 = vmatpush.bf16.msra.mxu0 %v1943_v13 }
 0x1ca   :  { %1039 = vmatpush.bf16.msra.mxu1 %v1899_v47  ;;  %1052 = vmatpush.bf16.msra.mxu2 %v1947_v14 }
 0x1cd   :  { %972 = vmatpush.bf16.msra.mxu0 %v1950_v27 }
 0x1ce   :  { %1040 = vmatpush.bf16.msra.mxu1 %v1902_v59  ;;  %1053 = vmatpush.bf16.msra.mxu2 %v1954_v28 }
 0x1d1   :  { %973 = vmatpush.bf16.msra.mxu0 %v1959_v34 }
 0x1d2   :  { %1041 = vmatpush.bf16.msra.mxu1 %v1905_v9  ;;  %1054 = vmatpush.bf16.msra.mxu2 %v1962_v35 }
 0x231   :  { %v761_v37 = vpop.f32.mrf.mxu0  ;;  %v774_v29 = vpop.f32.mrf.mxu1 }
 0x232   :  { %v791_v40 = vadd.f32 %v761_v37, %v2030_v51  ;;  %v811_v58 = vadd.f32 %v774_v29, %v327_v23 }
 0x234   :  { %v1548_v32 = vmul.f32 -1.442695, %v791_v40  ;;  %v1549_v3 = vmul.f32 -1.442695, %v811_v58 }
 0x236   :  { %1643 = vpow2.f32 %v1548_v32 }
 0x237   :  { %1645 = vpow2.f32 %v1549_v3  ;;  %v356_v3 = vadd.f32 %v2084_v20, %v2045_v43 }
 0x238   :  { %v787_v5 = vpop.f32.mrf.mxu2 }
 0x239   :  { %v763_v12 = vpop.f32.mrf.mxu0  ;;  %v776_v16 = vpop.f32.mrf.mxu1  ;;  %v831_v40 = vadd.f32 %v2050_v46, %v787_v5 }
 0x23c   :  { %v1644_v19 = vpop.eup %1643 }
 0x23d   :  { %v1646_v22 = vpop.eup %1645  ;;  %v795_v25 = vadd.f32 1.0, %v1644_v19 }
 0x23e   :  { %v815_v44 = vadd.f32 1.0, %v1646_v22 }
 0x23f   :  { %1647 = vrcp.f32 %v795_v25  ;;  %v807_v63 = vand.u32 2147483648, %v795_v25  ;;  %v805_v31 = vand.u32 2147483647, %v795_v25  ;;  %vm801_vm1 = vweird.f32 %v795_v25 }
 0x240   :  { %1649 = vrcp.f32 %v815_v44  ;;  %v789_v39 = vpop.f32.mrf.mxu2  ;;  %v827_v12 = vand.u32 2147483648, %v815_v44  ;;  %vm821_vm5 = vweird.f32 %v815_v44  ;;  %v825_v19 = vand.u32 2147483647, %v815_v44 }
 0x241   :  { %v808_v37 = vor.u32 1.1754944e-38, %v807_v63  ;;  %vm806_vm3 = vcmp.eq.f32.partialorder %v805_v31, 8.507059e+37 }
 0x242   :  { %vm826_vm7 = vcmp.eq.f32.partialorder %v825_v19, 8.507059e+37 }
 0x245   :  { %v1648_v33 = vpop.eup %1647 }
 0x246   :  { %v1650_v18 = vpop.eup %1649  ;;  %v797_v61 = vmul.f32 %v1648_v33, %v795_v25  ;;  %vm802_vm0 = vweird.f32 %v1648_v33  ;;  %v828_v25 = vor.u32 1.1754944e-38, %v827_v12 }
 0x247   :  { %v817_v60 = vmul.f32 %v1650_v18, %v815_v44  ;;  %vm803_vm2 = vmor %vm801_vm1, %vm802_vm0  ;;  %vm822_vm4 = vweird.f32 %v1650_v18 }
 0x248   :  { %v798_v51 = vsub.f32 1.0, %v797_v61  ;;  %vm823_vm6 = vmor %vm821_vm5, %vm822_vm4 }
 0x249   :  { %v818_v21 = vsub.f32 1.0, %v817_v60 }
 0x24a   :  { %v799_v0 = vmul.f32 %v1648_v33, %v798_v51 }
 0x24b   :  { %v819_v6 = vmul.f32 %v1650_v18, %v818_v21 }
 0x24c   :  { %v800_v23 = vadd.f32 %v1648_v33, %v799_v0 }
 0x24d   :  { %v820_v32 = vadd.f32 %v1650_v18, %v819_v6 }
 0x24e   :  { %v804_v29 = vsel %vm803_vm2, %v1648_v33, %v800_v23 }
 0x24f   :  { %v809_v58 = vsel %vm806_vm3, %v808_v37, %v804_v29  ;;  %v824_v39 = vsel %vm823_vm6, %v1650_v18, %v820_v32 }
 0x250   :  { %v832_v16 = vmul.f32 %v831_v40, %v809_v58  ;;  %v829_v33 = vsel %vm826_vm7, %v828_v25, %v824_v39 }
 0x251   :  { %v835_v61 = vsub.f32 1.0, %v829_v33  ;;  %v837_v51 = vmul.f32 %v829_v33, %v2111_v4  ;;  %v329_v4 = vadd.f32 %v2086_v38, %v2034_v57 }
 0x252   :  { %v833_v22 = vadd.f32 %v832_v16, %v356_v3 }
 0x254   :  { %1651 = vtanh.f32 %v833_v22 }
 0x25a   :  { %v1652_v60 = vpop.eup %1651 }
 0x25b   :  { %v836_v5 = vmul.f32 %v1652_v60, %v835_v61 }
 0x25d   :  { %v2146_v21 = vadd.f32 %v837_v51, %v836_v5 }
 0x25f   :  { %v845_v20 = vpack.c.bf16 %v2146_v21, %v2146_v21 }
 0x261   :  { %854 = vmatmul.bf16.vlgmr.msrb.gmra.mxu3 %v845_v20  ;;  %867 = vmatmul.bf16.vlgmr.msrb.gmra.mxu0 %v845_v20 }
 0x262   :  { %880 = vmatmul.bf16.vlgmr.msrb.gmra.mxu1 %v845_v20  ;;  %1060 = vmatpush.bf16.msrb.mxu3 %v1907_v10 }
 0x263   :  { %1128 = vmatpush.bf16.msrb.mxu0 %v1884_v7  ;;  %1141 = vmatpush.bf16.msrb.mxu1 %v1909_v15 }
 0x266   :  { %1061 = vmatpush.bf16.msrb.mxu3 %v1915_v26 }
 0x267   :  { %1129 = vmatpush.bf16.msrb.mxu0 %v1887_v11  ;;  %1142 = vmatpush.bf16.msrb.mxu1 %v1918_v30 }
 0x26a   :  { %1062 = vmatpush.bf16.msrb.mxu3 %v1923_v42 }
 0x26b   :  { %1130 = vmatpush.bf16.msrb.mxu0 %v1890_v17  ;;  %1143 = vmatpush.bf16.msrb.mxu1 %v1926_v45 }
 0x26e   :  { %1063 = vmatpush.bf16.msrb.mxu3 %v1929_v55 }
 0x26f   :  { %1131 = vmatpush.bf16.msrb.mxu0 %v1893_v24  ;;  %1144 = vmatpush.bf16.msrb.mxu1 %v1932_v56 }
 0x272   :  { %1064 = vmatpush.bf16.msrb.mxu3 %v1935_v1 }
 0x273   :  { %1132 = vmatpush.bf16.msrb.mxu0 %v1896_v36  ;;  %1145 = vmatpush.bf16.msrb.mxu1 %v1939_v2 }
 0x276   :  { %1065 = vmatpush.bf16.msrb.mxu3 %v1943_v13 }
 0x277   :  { %1133 = vmatpush.bf16.msrb.mxu0 %v1899_v47  ;;  %1146 = vmatpush.bf16.msrb.mxu1 %v1947_v14 }
 0x27a   :  { %1066 = vmatpush.bf16.msrb.mxu3 %v1950_v27 }
 0x27b   :  { %1134 = vmatpush.bf16.msrb.mxu0 %v1902_v59  ;;  %1147 = vmatpush.bf16.msrb.mxu1 %v1954_v28 }
 0x27e   :  { %1067 = vmatpush.bf16.msrb.mxu3 %v1959_v34 }
 0x27f   :  { %1135 = vmatpush.bf16.msrb.mxu0 %v1905_v9  ;;  %1148 = vmatpush.bf16.msrb.mxu1 %v1962_v35 }
 0x2de   :  { %v868_v44 = vpop.f32.mrf.mxu0 }
 0x2df   :  { %v905_v18 = vadd.f32 %v868_v44, %v329_v4  ;;  %v881_v63 = vpop.f32.mrf.mxu1 }
 0x2e0   :  { %v925_v20 = vadd.f32 %v2050_v46, %v881_v63 }
 0x2e1   :  { %v1551_v0 = vmul.f32 -1.442695, %v905_v18 }
 0x2e3   :  { %1653 = vpow2.f32 %v1551_v0  ;;  %v358_v0 = vadd.f32 %v2088_v41, %v2045_v43 }
 0x2e4   :  { %v855_v31 = vpop.f32.mrf.mxu3 }
 0x2e5   :  { %v885_v6 = vadd.f32 %v855_v31, %v2032_v54 }
 0x2e6   :  { %v870_v23 = vpop.f32.mrf.mxu0 }
 0x2e7   :  { %v1550_v37 = vmul.f32 -1.442695, %v885_v6  ;;  %v883_v29 = vpop.f32.mrf.mxu1 }
 0x2e9   :  { %v1654_v40 = vpop.eup %1653  ;;  %1655 = vpow2.f32 %v1550_v37 }
 0x2ea   :  { %v909_v58 = vadd.f32 1.0, %v1654_v40 }
 0x2ec   :  { %v857_v32 = vpop.f32.mrf.mxu3  ;;  %1657 = vrcp.f32 %v909_v58  ;;  %v921_v31 = vand.u32 2147483648, %v909_v58  ;;  %vm915_vm13 = vweird.f32 %v909_v58  ;;  %v919_v23 = vand.u32 2147483647, %v909_v58 }
 0x2ee   :  { %v922_v40 = vor.u32 1.1754944e-38, %v921_v31  ;;  %vm920_vm15 = vcmp.eq.f32.partialorder %v919_v23, 8.507059e+37 }
 0x2ef   :  { %v1656_v3 = vpop.eup %1655 }
 0x2f0   :  { %v889_v12 = vadd.f32 1.0, %v1656_v3 }
 0x2f2   :  { %1659 = vrcp.f32 %v889_v12  ;;  %v1658_v38 = vpop.eup %1657  ;;  %v901_v33 = vand.u32 2147483648, %v889_v12  ;;  %v899_v54 = vand.u32 2147483647, %v889_v12  ;;  %vm895_vm9 = vweird.f32 %v889_v12 }
 0x2f3   :  { %v911_v16 = vmul.f32 %v1658_v38, %v909_v58  ;;  %vm916_vm12 = vweird.f32 %v1658_v38 }
 0x2f4   :  { %v902_v51 = vor.u32 1.1754944e-38, %v901_v33  ;;  %vm900_vm11 = vcmp.eq.f32.partialorder %v899_v54, 8.507059e+37  ;;  %vm917_vm14 = vmor %vm915_vm13, %vm916_vm12 }
 0x2f5   :  { %v912_v39 = vsub.f32 1.0, %v911_v16 }
 0x2f7   :  { %v913_v60 = vmul.f32 %v1658_v38, %v912_v39 }
 0x2f8   :  { %v1660_v19 = vpop.eup %1659 }
 0x2f9   :  { %v891_v22 = vmul.f32 %v1660_v19, %v889_v12  ;;  %vm896_vm8 = vweird.f32 %v1660_v19  ;;  %v914_v18 = vadd.f32 %v1658_v38, %v913_v60 }
 0x2fa   :  { %vm897_vm10 = vmor %vm895_vm9, %vm896_vm8 }
 0x2fb   :  { %v892_v25 = vsub.f32 1.0, %v891_v22  ;;  %v918_v29 = vsel %vm917_vm14, %v1658_v38, %v914_v18 }
 0x2fc   :  { %v923_v32 = vsel %vm920_vm15, %v922_v40, %v918_v29 }
 0x2fd   :  { %v893_v61 = vmul.f32 %v1660_v19, %v892_v25  ;;  %v929_v63 = vsub.f32 1.0, %v923_v32  ;;  %v931_v16 = vmul.f32 %v923_v32, %v2146_v21 }
 0x2ff   :  { %v894_v5 = vadd.f32 %v1660_v19, %v893_v61 }
 0x301   :  { %v898_v4 = vsel %vm897_vm10, %v1660_v19, %v894_v5 }
 0x302   :  { %v903_v44 = vsel %vm900_vm11, %v902_v51, %v898_v4  ;;  %v361_v4 = vadd.f32 %v2092_v49, %v2045_v43 }
 0x303   :  { %v926_v6 = vmul.f32 %v925_v20, %v903_v44 }
 0x305   :  { %v927_v37 = vadd.f32 %v926_v6, %v358_v0 }
 0x307   :  { %1661 = vtanh.f32 %v927_v37 }
 0x30d   :  { %v1662_v3 = vpop.eup %1661 }
 0x30e   :  { %v930_v12 = vmul.f32 %v1662_v3, %v929_v63 }
 0x310   :  { %v2181_v19 = vadd.f32 %v931_v16, %v930_v12 }
 0x312   :  { %v939_v41 = vpack.c.bf16 %v2181_v19, %v2181_v19 }
 0x314   :  { %948 = vmatmul.bf16.vlgmr.msrb.gmra.mxu2 %v939_v41  ;;  %961 = vmatmul.bf16.vlgmr.msra.gmra.mxu3 %v939_v41 }
 0x315   :  { %974 = vmatmul.bf16.vlgmr.msra.gmra.mxu0 %v939_v41  ;;  %1154 = vmatpush.bf16.msrb.mxu2 %v1907_v10 }
 0x316   :  { %1222 = vmatpush.bf16.msra.mxu3 %v1884_v7  ;;  %1235 = vmatpush.bf16.msra.mxu0 %v1909_v15 }
 0x319   :  { %1155 = vmatpush.bf16.msrb.mxu2 %v1915_v26 }
 0x31a   :  { %1223 = vmatpush.bf16.msra.mxu3 %v1887_v11  ;;  %1236 = vmatpush.bf16.msra.mxu0 %v1918_v30  ;;  %v332_v11 = vadd.f32 %v2090_v48, %v2034_v57 }
 0x31d   :  { %1156 = vmatpush.bf16.msrb.mxu2 %v1923_v42 }
 0x31e   :  { %1224 = vmatpush.bf16.msra.mxu3 %v1890_v17  ;;  %1237 = vmatpush.bf16.msra.mxu0 %v1926_v45 }
 0x321   :  { %1157 = vmatpush.bf16.msrb.mxu2 %v1929_v55 }
 0x322   :  { %1225 = vmatpush.bf16.msra.mxu3 %v1893_v24  ;;  %1238 = vmatpush.bf16.msra.mxu0 %v1932_v56 }
 0x325   :  { %1158 = vmatpush.bf16.msrb.mxu2 %v1935_v1 }
 0x326   :  { %1226 = vmatpush.bf16.msra.mxu3 %v1896_v36  ;;  %1239 = vmatpush.bf16.msra.mxu0 %v1939_v2 }
 0x329   :  { %1159 = vmatpush.bf16.msrb.mxu2 %v1943_v13 }
 0x32a   :  { %1227 = vmatpush.bf16.msra.mxu3 %v1899_v47  ;;  %1240 = vmatpush.bf16.msra.mxu0 %v1947_v14 }
 0x32d   :  { %1160 = vmatpush.bf16.msrb.mxu2 %v1950_v27 }
 0x32e   :  { %1228 = vmatpush.bf16.msra.mxu3 %v1902_v59  ;;  %1241 = vmatpush.bf16.msra.mxu0 %v1954_v28 }
 0x331   :  { %1161 = vmatpush.bf16.msrb.mxu2 %v1959_v34 }
 0x332   :  { %1229 = vmatpush.bf16.msra.mxu3 %v1905_v9  ;;  %1242 = vmatpush.bf16.msra.mxu0 %v1962_v35 }
 0x392   :  { %v975_v7 = vpop.f32.mrf.mxu0 }
 0x393   :  { %v1019_v60 = vadd.f32 %v2050_v46, %v975_v7 }
 0x397   :  { %v949_v17 = vpop.f32.mrf.mxu2  ;;  %v962_v24 = vpop.f32.mrf.mxu3 }
 0x398   :  { %v979_v36 = vadd.f32 %v949_v17, %v2036_v62  ;;  %v999_v47 = vadd.f32 %v962_v24, %v332_v11 }
 0x39a   :  { %v1552_v15 = vmul.f32 -1.442695, %v979_v36  ;;  %v1553_v30 = vmul.f32 -1.442695, %v999_v47  ;;  %v977_v59 = vpop.f32.mrf.mxu0 }
 0x39c   :  { %1663 = vpow2.f32 %v1552_v15 }
 0x39d   :  { %1665 = vpow2.f32 %v1553_v30 }
 0x39f   :  { %v951_v45 = vpop.f32.mrf.mxu2  ;;  %v964_v56 = vpop.f32.mrf.mxu3 }
 0x3a2   :  { %v1664_v2 = vpop.eup %1663 }
 0x3a3   :  { %v1666_v9 = vpop.eup %1665  ;;  %v983_v14 = vadd.f32 1.0, %v1664_v2 }
 0x3a4   :  { %v1003_v28 = vadd.f32 1.0, %v1666_v9 }
 0x3a5   :  { %1667 = vrcp.f32 %v983_v14  ;;  %v995_v62 = vand.u32 2147483648, %v983_v14  ;;  %v993_v25 = vand.u32 2147483647, %v983_v14  ;;  %vm989_vm1 = vweird.f32 %v983_v14 }
 0x3a6   :  { %1669 = vrcp.f32 %v1003_v28  ;;  %v1015_v18 = vand.u32 2147483648, %v1003_v28  ;;  %vm1009_vm5 = vweird.f32 %v1003_v28  ;;  %v1013_v0 = vand.u32 2147483647, %v1003_v28 }
 0x3a7   :  { %v996_v54 = vor.u32 1.1754944e-38, %v995_v62  ;;  %vm994_vm3 = vcmp.eq.f32.partialorder %v993_v25, 8.507059e+37 }
 0x3a8   :  { %v1016_v23 = vor.u32 1.1754944e-38, %v1015_v18  ;;  %vm1014_vm7 = vcmp.eq.f32.partialorder %v1013_v0, 8.507059e+37  ;;  %v2268_v18 = vld [vmem:[#allocation16_spill] sm:$0xff] }
 0x3ab   :  { %v1668_v35 = vpop.eup %1667 }
 0x3ac   :  { %v1670_v48 = vpop.eup %1669  ;;  %v985_v21 = vmul.f32 %v1668_v35, %v983_v14  ;;  %vm990_vm0 = vweird.f32 %v1668_v35 }
 0x3ad   :  { %v1005_v58 = vmul.f32 %v1670_v48, %v1003_v28  ;;  %vm991_vm2 = vmor %vm989_vm1, %vm990_vm0  ;;  %vm1010_vm4 = vweird.f32 %v1670_v48  ;;  %v363_v28 = vadd.f32 %v2096_v52, %v2045_v43 }
 0x3ae   :  { %v986_v38 = vsub.f32 1.0, %v985_v21  ;;  %vm1011_vm6 = vmor %vm1009_vm5, %vm1010_vm4 }
 0x3af   :  { %v1006_v22 = vsub.f32 1.0, %v1005_v58 }
 0x3b0   :  { %v987_v39 = vmul.f32 %v1668_v35, %v986_v38 }
 0x3b1   :  { %v1007_v33 = vmul.f32 %v1670_v48, %v1006_v22 }
 0x3b2   :  { %v988_v61 = vadd.f32 %v1668_v35, %v987_v39 }
 0x3b3   :  { %v1008_v20 = vadd.f32 %v1670_v48, %v1007_v33 }
 0x3b4   :  { %v992_v5 = vsel %vm991_vm2, %v1668_v35, %v988_v61 }
 0x3b5   :  { %v997_v51 = vsel %vm994_vm3, %v996_v54, %v992_v5  ;;  %v1012_v6 = vsel %vm1011_vm6, %v1670_v48, %v1008_v20  ;;  %v337_v20 = vadd.f32 %v2098_v53, %v2034_v57 }
 0x3b6   :  { %v1020_v44 = vmul.f32 %v1019_v60, %v997_v51  ;;  %v1017_v37 = vsel %vm1014_vm7, %v1016_v23, %v1012_v6 }
 0x3b7   :  { %v1023_v29 = vsub.f32 1.0, %v1017_v37  ;;  %v1025_v63 = vmul.f32 %v1017_v37, %v2181_v19 }
 0x3b8   :  { %v1021_v31 = vadd.f32 %v1020_v44, %v361_v4 }
 0x3ba   :  { %1671 = vtanh.f32 %v1021_v31 }
 0x3c0   :  { %v1672_v40 = vpop.eup %1671 }
 0x3c1   :  { %v1024_v32 = vmul.f32 %v1672_v40, %v1023_v29 }
 0x3c3   :  { %v2216_v3 = vadd.f32 %v1025_v63, %v1024_v32 }
 0x3c5   :  { %v1033_v49 = vpack.c.bf16 %v2216_v3, %v2216_v3 }
 0x3c7   :  { %1042 = vmatmul.bf16.vlgmr.msra.gmra.mxu1 %v1033_v49  ;;  %1055 = vmatmul.bf16.vlgmr.msra.gmra.mxu2 %v1033_v49 }
 0x3c8   :  { %1068 = vmatmul.bf16.vlgmr.msrb.gmra.mxu3 %v1033_v49  ;;  %1248 = vmatpush.bf16.msra.mxu1 %v1907_v10  ;;  %v334_v10 = vadd.f32 %v2094_v50, %v2034_v57 }
 0x3cc   :  { %1249 = vmatpush.bf16.msra.mxu1 %v1915_v26 }
 0x3d0   :  { %1250 = vmatpush.bf16.msra.mxu1 %v1923_v42 }
 0x3d4   :  { %1251 = vmatpush.bf16.msra.mxu1 %v1929_v55 }
 0x3d8   :  { %1252 = vmatpush.bf16.msra.mxu1 %v1935_v1 }
 0x3dc   :  { %1253 = vmatpush.bf16.msra.mxu1 %v1943_v13 }
 0x3e0   :  { %1254 = vmatpush.bf16.msra.mxu1 %v1950_v27 }
 0x3e4   :  { %1255 = vmatpush.bf16.msra.mxu1 %v1959_v34 }
 0x444   :  { %v1043_v12 = vpop.f32.mrf.mxu1 }
 0x445   :  { %v1073_v16 = vadd.f32 %v1043_v12, %v2039_v8 }
 0x447   :  { %v1554_v19 = vmul.f32 -1.442695, %v1073_v16 }
 0x449   :  { %1673 = vpow2.f32 %v1554_v19 }
 0x44a   :  { %v1056_v26 = vpop.f32.mrf.mxu2 }
 0x44b   :  { %v1093_v42 = vadd.f32 %v1056_v26, %v334_v10  ;;  %v1069_v41 = vpop.f32.mrf.mxu3 }
 0x44c   :  { %v1045_v55 = vpop.f32.mrf.mxu1  ;;  %v1113_v14 = vadd.f32 %v2050_v46, %v1069_v41 }
 0x44d   :  { %v1555_v7 = vmul.f32 -1.442695, %v1093_v42 }
 0x44f   :  { %v1674_v1 = vpop.eup %1673  ;;  %1675 = vpow2.f32 %v1555_v7 }
 0x450   :  { %v1077_v13 = vadd.f32 1.0, %v1674_v1 }
 0x452   :  { %1677 = vrcp.f32 %v1077_v13  ;;  %v1058_v27 = vpop.f32.mrf.mxu2  ;;  %v1089_v47 = vand.u32 2147483648, %v1077_v13  ;;  %v1087_v15 = vand.u32 2147483647, %v1077_v13  ;;  %vm1083_vm9 = vweird.f32 %v1077_v13 }
 0x453   :  { %v1071_v11 = vpop.f32.mrf.mxu3 }
 0x454   :  { %v1090_v56 = vor.u32 1.1754944e-38, %v1089_v47  ;;  %vm1088_vm11 = vcmp.eq.f32.partialorder %v1087_v15, 8.507059e+37 }
 0x455   :  { %v1676_v34 = vpop.eup %1675 }
 0x456   :  { %v1097_v17 = vadd.f32 1.0, %v1676_v34 }
 0x458   :  { %v1678_v24 = vpop.eup %1677  ;;  %1679 = vrcp.f32 %v1097_v17  ;;  %v1109_v21 = vand.u32 2147483648, %v1097_v17  ;;  %v1107_v38 = vand.u32 2147483647, %v1097_v17  ;;  %vm1103_vm13 = vweird.f32 %v1097_v17 }
 0x459   :  { %v1079_v8 = vmul.f32 %v1678_v24, %v1077_v13  ;;  %vm1084_vm8 = vweird.f32 %v1678_v24 }
 0x45a   :  { %vm1085_vm10 = vmor %vm1083_vm9, %vm1084_vm8  ;;  %v1110_v39 = vor.u32 1.1754944e-38, %v1109_v21  ;;  %vm1108_vm15 = vcmp.eq.f32.partialorder %v1107_v38, 8.507059e+37 }
 0x45b   :  { %v1080_v36 = vsub.f32 1.0, %v1079_v8  ;;  %v2269_v8 = vld [vmem:[#allocation18_spill] sm:$0xff] }
 0x45d   :  { %v1081_v50 = vmul.f32 %v1678_v24, %v1080_v36  ;;  %v366_v36 = vadd.f32 %v2269_v8, %v2045_v43 }
 0x45e   :  { %v1680_v30 = vpop.eup %1679 }
 0x45f   :  { %v1099_v59 = vmul.f32 %v1680_v30, %v1097_v17  ;;  %v1082_v45 = vadd.f32 %v1678_v24, %v1081_v50  ;;  %vm1104_vm12 = vweird.f32 %v1680_v30 }
 0x460   :  { %vm1105_vm14 = vmor %vm1103_vm13, %vm1104_vm12 }
 0x461   :  { %v1100_v2 = vsub.f32 1.0, %v1099_v59  ;;  %v1086_v9 = vsel %vm1085_vm10, %v1678_v24, %v1082_v45 }
 0x462   :  { %v1091_v35 = vsel %vm1088_vm11, %v1090_v56, %v1086_v9 }
 0x463   :  { %v1101_v48 = vmul.f32 %v1680_v30, %v1100_v2  ;;  %v1114_v58 = vmul.f32 %v1113_v14, %v1091_v35 }
 0x465   :  { %v1115_v62 = vadd.f32 %v1114_v58, %v363_v28  ;;  %v1102_v22 = vadd.f32 %v1680_v30, %v1101_v48  ;;  %v2270_v48 = vld [vmem:[#allocation19_spill] sm:$0xff] }
 0x466   :  { %v339_v21 = vadd.f32 %v2270_v48, %v2034_v57 }
 0x467   :  { %1681 = vtanh.f32 %v1115_v62  ;;  %v1106_v25 = vsel %vm1105_vm14, %v1680_v30, %v1102_v22 }
 0x468   :  { %v1111_v33 = vsel %vm1108_vm15, %v1110_v39, %v1106_v25  ;;  %v2271_v25 = vld [vmem:[#allocation17_spill] sm:$0xff] }
 0x469   :  { %v1117_v61 = vsub.f32 1.0, %v1111_v33  ;;  %v1119_v52 = vmul.f32 %v1111_v33, %v2216_v3 }
 0x46d   :  { %v1682_v54 = vpop.eup %1681 }
 0x46e   :  { %v1118_v60 = vmul.f32 %v1682_v54, %v1117_v61 }
 0x470   :  { %v1120_v5 = vadd.f32 %v1119_v52, %v1118_v60 }
 0x472   :  { %v1127_v51 = vpack.c.bf16 %v1120_v5, %v1120_v5 }
 0x474   :  { %1136 = vmatmul.bf16.vlgmr.msrb.gmra.mxu0 %v1127_v51  ;;  %1149 = vmatmul.bf16.vlgmr.msrb.gmra.mxu1 %v1127_v51 }
 0x475   :  { %1162 = vmatmul.bf16.vlgmr.msrb.gmra.mxu2 %v1127_v51 }
 0x4f1   :  { %v1137_v4 = vpop.f32.mrf.mxu0  ;;  %v1150_v44 = vpop.f32.mrf.mxu1 }
 0x4f2   :  { %v1167_v0 = vadd.f32 %v1137_v4, %v2268_v18  ;;  %v1187_v31 = vadd.f32 %v1150_v44, %v337_v20 }
 0x4f4   :  { %v1556_v6 = vmul.f32 -1.442695, %v1167_v0  ;;  %v1557_v23 = vmul.f32 -1.442695, %v1187_v31 }
 0x4f6   :  { %1683 = vpow2.f32 %v1556_v6 }
 0x4f7   :  { %1685 = vpow2.f32 %v1557_v23 }
 0x4f8   :  { %v1163_v37 = vpop.f32.mrf.mxu2 }
 0x4f9   :  { %v1139_v29 = vpop.f32.mrf.mxu0  ;;  %v1152_v40 = vpop.f32.mrf.mxu1  ;;  %v1207_v34 = vadd.f32 %v2050_v46, %v1163_v37 }
 0x4fc   :  { %v1684_v32 = vpop.eup %1683 }
 0x4fd   :  { %v1686_v63 = vpop.eup %1685  ;;  %v1171_v3 = vadd.f32 1.0, %v1684_v32 }
 0x4fe   :  { %v1191_v49 = vadd.f32 1.0, %v1686_v63 }
 0x4ff   :  { %1687 = vrcp.f32 %v1171_v3  ;;  %v1183_v41 = vand.u32 2147483648, %v1171_v3  ;;  %v1181_v7 = vand.u32 2147483647, %v1171_v3  ;;  %vm1177_vm1 = vweird.f32 %v1171_v3 }
 0x500   :  { %1689 = vrcp.f32 %v1191_v49  ;;  %v1165_v12 = vpop.f32.mrf.mxu2  ;;  %v1203_v47 = vand.u32 2147483648, %v1191_v49  ;;  %vm1197_vm5 = vweird.f32 %v1191_v49  ;;  %v1201_v15 = vand.u32 2147483647, %v1191_v49 }
 0x501   :  { %v1184_v27 = vor.u32 1.1754944e-38, %v1183_v41  ;;  %vm1182_vm3 = vcmp.eq.f32.partialorder %v1181_v7, 8.507059e+37 }
 0x502   :  { %v1204_v45 = vor.u32 1.1754944e-38, %v1203_v47  ;;  %vm1202_vm7 = vcmp.eq.f32.partialorder %v1201_v15, 8.507059e+37 }
 0x505   :  { %v1688_v53 = vpop.eup %1687 }
 0x506   :  { %v1690_v16 = vpop.eup %1689  ;;  %v1173_v19 = vmul.f32 %v1688_v53, %v1171_v3  ;;  %vm1178_vm0 = vweird.f32 %v1688_v53  ;;  %v1703_v3 = vld [vmem:[%s2261_s4] ss:$0 sm:$0xff]  ;;  %s1841_s4 = smov [#allocation11]  }
 0x507   :  { %v1193_v10 = vmul.f32 %v1690_v16, %v1191_v49  ;;  %vm1179_vm2 = vmor %vm1177_vm1, %vm1178_vm0  ;;  %vm1198_vm4 = vweird.f32 %v1690_v16  ;;  %s1315_s17 = sshll.u32 %s1841_s4, 4  ;;  %s1316_s17 = int_to_ptr.vmem [resolvable:$true] %s1315_s17 }
 0x508   :  { %v1174_v26 = vsub.f32 1.0, %v1173_v19  ;;  %vm1199_vm6 = vmor %vm1197_vm5, %vm1198_vm4  ;;  %v2272_v19 = vld [vmem:[#allocation20_spill] sm:$0xff] }
 0x509   :  { %v1194_v42 = vsub.f32 1.0, %v1193_v10  ;;  %v368_v10 = vadd.f32 %v2272_v19, %v2045_v43 }
 0x50a   :  { %v1175_v55 = vmul.f32 %v1688_v53, %v1174_v26 }
 0x50b   :  { %v1195_v1 = vmul.f32 %v1690_v16, %v1194_v42 }
 0x50c   :  { %v1176_v13 = vadd.f32 %v1688_v53, %v1175_v55 }
 0x50d   :  { %v1196_v24 = vadd.f32 %v1690_v16, %v1195_v1 }
 0x50e   :  { %v1180_v11 = vsel %vm1179_vm2, %v1688_v53, %v1176_v13 }
 0x50f   :  { %v1185_v17 = vsel %vm1182_vm3, %v1184_v27, %v1180_v11  ;;  %v1200_v59 = vsel %vm1199_vm6, %v1690_v16, %v1196_v24 }
 0x510   :  { %v1208_v50 = vmul.f32 %v1207_v34, %v1185_v17  ;;  %v1205_v56 = vsel %vm1202_vm7, %v1204_v45, %v1200_v59 }
 0x511   :  { %v1211_v2 = vsub.f32 1.0, %v1205_v56  ;;  %v1213_v14 = vmul.f32 %v1205_v56, %v1120_v5 }
 0x512   :  { %v1209_v30 = vadd.f32 %v1208_v50, %v366_v36 }
 0x514   :  { %1691 = vtanh.f32 %v1209_v30 }
 0x51a   :  { %v1692_v9 = vpop.eup %1691 }
 0x51b   :  { %v1212_v46 = vmul.f32 %v1692_v9, %v1211_v2 }
 0x51d   :  { %v2241_v28 = vadd.f32 %v1213_v14, %v1212_v46 }
 0x51f   :  { %v1221_v35 = vpack.c.bf16 %v2241_v28, %v2241_v28 }
 0x521   :  { %1230 = vmatmul.bf16.vlgmr.msra.gmra.mxu3 %v1221_v35  ;;  %1243 = vmatmul.bf16.vlgmr.msra.gmra.mxu0 %v1221_v35 }
 0x522   :  { %1256 = vmatmul.bf16.vlgmr.msra.gmra.mxu1 %v1221_v35 }
 0x59e   :  { %v1244_v58 = vpop.f32.mrf.mxu0 }
 0x59f   :  { %v1281_v38 = vadd.f32 %v1244_v58, %v339_v21  ;;  %v1257_v62 = vpop.f32.mrf.mxu1 }
 0x5a0   :  { %v1301_v49 = vadd.f32 %v1703_v3, %v1257_v62 }
 0x5a1   :  { %v1559_v22 = vmul.f32 -1.442695, %v1281_v38 }
 0x5a3   :  { %1693 = vpow2.f32 %v1559_v22 }
 0x5a4   :  { %v1231_v39 = vpop.f32.mrf.mxu3 }
 0x5a5   :  { %v1261_v33 = vadd.f32 %v1231_v39, %v2271_v25 }
 0x5a6   :  { %v1246_v61 = vpop.f32.mrf.mxu0 }
 0x5a7   :  { %v1558_v54 = vmul.f32 -1.442695, %v1261_v33  ;;  %v1259_v60 = vpop.f32.mrf.mxu1 }
 0x5a9   :  { %v1694_v52 = vpop.eup %1693  ;;  %1695 = vpow2.f32 %v1558_v54 }
 0x5aa   :  { %v1285_v5 = vadd.f32 1.0, %v1694_v52 }
 0x5ac   :  { %v1233_v51 = vpop.f32.mrf.mxu3  ;;  %1697 = vrcp.f32 %v1285_v5  ;;  %v1297_v26 = vand.u32 2147483648, %v1285_v5  ;;  %vm1291_vm13 = vweird.f32 %v1285_v5  ;;  %v1295_v41 = vand.u32 2147483647, %v1285_v5 }
 0x5ae   :  { %v1298_v1 = vor.u32 1.1754944e-38, %v1297_v26  ;;  %vm1296_vm15 = vcmp.eq.f32.partialorder %v1295_v41, 8.507059e+37 }
 0x5af   :  { %v1696_v20 = vpop.eup %1695 }
 0x5b0   :  { %v1265_v4 = vadd.f32 1.0, %v1696_v20 }
 0x5b2   :  { %1699 = vrcp.f32 %v1265_v4  ;;  %v1698_v57 = vpop.eup %1697  ;;  %v1277_v23 = vand.u32 2147483648, %v1265_v4  ;;  %v1275_v29 = vand.u32 2147483647, %v1265_v4  ;;  %vm1271_vm9 = vweird.f32 %v1265_v4 }
 0x5b3   :  { %v1287_v44 = vmul.f32 %v1698_v57, %v1285_v5  ;;  %vm1292_vm12 = vweird.f32 %v1698_v57 }
 0x5b4   :  { %v1278_v63 = vor.u32 1.1754944e-38, %v1277_v23  ;;  %vm1276_vm11 = vcmp.eq.f32.partialorder %v1275_v29, 8.507059e+37  ;;  %vm1293_vm14 = vmor %vm1291_vm13, %vm1292_vm12 }
 0x5b5   :  { %v1288_v31 = vsub.f32 1.0, %v1287_v44 }
 0x5b7   :  { %v1289_v40 = vmul.f32 %v1698_v57, %v1288_v31 }
 0x5b8   :  { %v1700_v18 = vpop.eup %1699 }
 0x5b9   :  { %v1267_v0 = vmul.f32 %v1700_v18, %v1265_v4  ;;  %vm1272_vm8 = vweird.f32 %v1700_v18  ;;  %v1290_v16 = vadd.f32 %v1698_v57, %v1289_v40 }
 0x5ba   :  { %vm1273_vm10 = vmor %vm1271_vm9, %vm1272_vm8 }
 0x5bb   :  { %v1268_v6 = vsub.f32 1.0, %v1267_v0  ;;  %v1294_v7 = vsel %vm1293_vm14, %v1698_v57, %v1290_v16 }
 0x5bc   :  { %v1299_v13 = vsel %vm1296_vm15, %v1298_v1, %v1294_v7 }
 0x5bd   :  { %v1269_v37 = vmul.f32 %v1700_v18, %v1268_v6  ;;  %v1305_v27 = vsub.f32 1.0, %v1299_v13  ;;  %v1307_v34 = vmul.f32 %v1299_v13, %v2241_v28 }
 0x5bf   :  { %v1270_v32 = vadd.f32 %v1700_v18, %v1269_v37 }
 0x5c1   :  { %v1274_v12 = vsel %vm1273_vm10, %v1700_v18, %v1270_v32 }
 0x5c2   :  { %v1279_v53 = vsel %vm1276_vm11, %v1278_v63, %v1274_v12 }
 0x5c3   :  { %v1302_v42 = vmul.f32 %v1301_v49, %v1279_v53 }
 0x5c5   :  { %v1303_v55 = vadd.f32 %v1302_v42, %v368_v10 }
 0x5c7   :  { %1701 = vtanh.f32 %v1303_v55 }
 0x5cd   :  { %v1702_v11 = vpop.eup %1701 }
 0x5ce   :  { %v1306_v43 = vmul.f32 %v1702_v11, %v1305_v27 }
 0x5d0   :  { %v1308_v17 = vadd.f32 %v1307_v34, %v1306_v43 }
 0x5d2   :  { %1309 = vst [vmem:[#allocation11] sm:$0xff] %v1308_v17 }
 0x5d3   :  { %1320 = dma.vmem_to_hbm [thread:$0]  %s1316_s17, 128, %s1318_s20, [#allocation5]  }
 0x5d4   :  { %1830 = dma.done.wait [#allocation5], 128  }
 0x5d5   :  { %1831 = vsyncadd [#allocation5], 4294967168 }
 0x5d6   :  { %1325 = vsyncpa [#allocation4], 1 }
 0x5d7   :  { %1326 = vsyncpa [#allocation7], 1 }
 0x5d8   :  { %1327 = vsyncpa [#allocation10], 1 }
 0x5d9   :  { %1328 = vsyncpa [#allocation5], 1 }

</bundles_post_ra>
